<compile_context>
chip_gen: v7x
topology: tpu7x:2x2x1
jax: 0.10.0
libtpu: 0.0.40
codegen_flags: <defaults>
</compile_context>

<pallas_src>
import functools

import jax
import jax.numpy as jnp
import numpy as np
from jax import lax
from jax.experimental import pallas as pl
from jax.experimental.pallas import tpu as pltpu


_BN_TILE_BUDGET = 8 * 1024 * 1024   # VMEM budget for a kernel-2 block (double-buffered)


def _round_up(x, q):
    return -(-x // q) * q


def _vmem_limit_bytes():
    cap = None
    try:
        info_fn = getattr(pltpu, "get_tpu_info", None)
        if info_fn is not None:
            cap = getattr(info_fn(), "vmem_capacity_bytes", None)
    except Exception:
        cap = None
    if not cap:
        cap = 64 * 1024 * 1024          # conservative (v7x physical)
    return int(min(100 * 1024 * 1024, cap * 3 // 4))


def _pick_tile(total, cap):
    """Largest divisor of `total` that is a multiple of 128 and <= cap (else `total`)."""
    if total <= cap or total % 128 != 0:
        return total
    t = (cap // 128) * 128
    while t >= 128:
        if total % t == 0:
            return t
        t -= 128
    return total


# ---------------------------------------------------------------------------
# Kernel 1: partial conv (9 shifted matmuls) + factor multiply + fused BN statistics,
#           channel-major bf16 output.
# ---------------------------------------------------------------------------
def _pconv_stats_kernel(xf_ref, fac_ref, w_ref, co_ref, ssum_ref, ssq_ref, *, wp2, cout):
    # xf_ref:  (1, Cinp, Lf)   f32   flattened, spatially padded, premultiplied activation
    # fac_ref: (1, 1, Lm)      f32   per-pixel mask_ratio * update_mask (0 on junk columns)
    # w_ref:   (9, Coutp, Cinp) bf16 conv taps
    # co_ref:  (1, Cout, Lm)   bf16  channel-major conv result (real channels only)
    # ssum_ref/ssq_ref: (1, Coutp, 1) f32 per-image BN statistics
    lm = fac_ref.shape[2]
    xfull = xf_ref[0].astype(jnp.bfloat16)                      # (Cinp, Lf)
    acc = jnp.zeros((w_ref.shape[1], lm), jnp.float32)
    for t in range(9):
        dh, dw = divmod(t, 3)
        off = dh * wp2 + dw
        xs = xfull[:, off:off + lm]                             # (Cinp, Lm) static lane slice
        acc = acc + jnp.dot(w_ref[t], xs, preferred_element_type=jnp.float32)
    out = acc * fac_ref[0]                                      # (Coutp, Lm) f32
    co_ref[0] = out[:cout, :].astype(jnp.bfloat16)
    ssum_ref[0] = jnp.sum(out, axis=1, keepdims=True)
    ssq_ref[0] = jnp.sum(out * out, axis=1, keepdims=True)


# ---------------------------------------------------------------------------
# Kernel 2: BN apply + ReLU — pure lane-dense stream, per-channel coeffs on sublanes
# ---------------------------------------------------------------------------
def _bn_relu_kernel(x_ref, scale_ref, shift_ref, o_ref):
    x = x_ref[0].astype(jnp.float32)                            # (Cout, ts)
    o_ref[0] = jnp.maximum(x * scale_ref[...] + shift_ref[...], 0.0)


# ---------------------------------------------------------------------------
# Wrapper
# ---------------------------------------------------------------------------
def pconv_bn_activ(images, masks, weight, gamma, beta, *, eps=1e-5):
    """PConvBNActiv(sample='none-3', activ='relu', bias=False) forward.
    Returns (out NCHW f32, update_mask NCHW f32)."""
    n, cin, h, w = images.shape
    cout = weight.shape[0]
    k = 3
    wp2, hp2 = w + 2, h + 2
    mimg = h * wp2                               # flat per-image output length (padded width)
    lm = _round_up(mimg, 128)                    # lane-dense flat length
    lf = _round_up(lm + 2 * wp2 + 2, 128)        # flat input length (covers max tap offset)
    cinp = _round_up(cin, 8)
    coutp = _round_up(cout, 8)

    # ---- partial-conv mask bookkeeping (tiny, per-pixel, f32) ----
    msum = jnp.sum(masks, axis=1, keepdims=True)                         # (N,1,H,W)
    usum = lax.reduce_window(msum, 0.0, lax.add, (1, 1, k, k), (1, 1, 1, 1),
                             ((0, 0), (0, 0), (1, 1), (1, 1)))
    slide_winsize = float(cin * k * k)
    mask_ratio = slide_winsize / (usum + 1e-8)
    update_mask = jnp.clip(usum, 0.0, 1.0)
    factor = mask_ratio * update_mask                                    # (N,1,H,W)

    fac = jnp.pad(factor, ((0, 0), (0, 0), (0, 0), (0, wp2 - w)))        # zero junk columns
    fac = fac.reshape(n, 1, mimg).astype(jnp.float32)
    fac = jnp.pad(fac, ((0, 0), (0, 0), (0, lm - mimg)))                 # (N,1,Lm)

    # ---- premultiplied, spatially padded, flattened activation (channels-first, f32) ----
    # TODO(synk): for very large H*W or Cout, switch to halo'd row-block DMA inside the
    # kernel instead of one whole image per grid step (VMEM scaling).
    xm = (images * masks).astype(jnp.float32)
    xp = jnp.pad(xm, ((0, 0), (0, cinp - cin), (1, 1), (1, 1)))          # (N,Cinp,Hp2,Wp2)
    xf = xp.reshape(n, cinp, hp2 * wp2)
    xf = jnp.pad(xf, ((0, 0), (0, 0), (0, lf - hp2 * wp2)))              # (N,Cinp,Lf)

    # ---- 3x3 conv taps, (9, Coutp, Cinp) bf16 ----
    wt = jnp.transpose(weight, (2, 3, 0, 1)).reshape(k * k, cout, cin)
    wt = jnp.pad(wt, ((0, 0), (0, coutp - cout), (0, cinp - cin))).astype(jnp.bfloat16)

    vmem_limit = _vmem_limit_bytes()

    conv_flat, ssum, ssq = pl.pallas_call(
        functools.partial(_pconv_stats_kernel, wp2=wp2, cout=cout),
        out_shape=(jax.ShapeDtypeStruct((n, cout, lm), jnp.bfloat16),
                   jax.ShapeDtypeStruct((n, coutp, 1), jnp.float32),
                   jax.ShapeDtypeStruct((n, coutp, 1), jnp.float32)),
        grid=(n,),
        in_specs=[pl.BlockSpec((1, cinp, lf), lambda i: (i, 0, 0)),
                  pl.BlockSpec((1, 1, lm), lambda i: (i, 0, 0)),
                  pl.BlockSpec((k * k, coutp, cinp), lambda i: (0, 0, 0))],
        out_specs=(pl.BlockSpec((1, cout, lm), lambda i: (i, 0, 0)),
                   pl.BlockSpec((1, coutp, 1), lambda i: (i, 0, 0)),
                   pl.BlockSpec((1, coutp, 1), lambda i: (i, 0, 0))),
        compiler_params=pltpu.CompilerParams(
            dimension_semantics=("parallel",),      # per-image stats -> safe on both v7x TCs
            vmem_limit_bytes=vmem_limit),
    )(xf, fac, wt)

    # ---- BatchNorm affine coefficients from the fused batch statistics (tiny, f32) ----
    cnt = float(n * h * w)
    sum_c = jnp.sum(ssum, axis=0)[:cout]             # (Cout,1)
    sq_c = jnp.sum(ssq, axis=0)[:cout]
    mean = sum_c / cnt
    # NOTE: E[x^2]-E[x]^2 in f32; fine at these sizes (see review correctness note).
    var = jnp.maximum(sq_c / cnt - mean * mean, 0.0)
    inv_std = lax.rsqrt(var + eps)
    scale = gamma.reshape(cout, 1).astype(jnp.float32) * inv_std
    shift = beta.reshape(cout, 1).astype(jnp.float32) - mean * scale

    # ---- BN apply + ReLU: lane-dense stream over the bf16 intermediate ----
    ts = _pick_tile(lm, max(128, (_BN_TILE_BUDGET // (12 * cout)) // 128 * 128))
    y = pl.pallas_call(
        _bn_relu_kernel,
        out_shape=jax.ShapeDtypeStruct((n, cout, lm), jnp.float32),
        grid=(n, lm // ts),
        in_specs=[pl.BlockSpec((1, cout, ts), lambda i, j: (i, 0, j)),
                  pl.BlockSpec((cout, 1), lambda i, j: (0, 0)),
                  pl.BlockSpec((cout, 1), lambda i, j: (0, 0))],
        out_specs=pl.BlockSpec((1, cout, ts), lambda i, j: (i, 0, j)),
        compiler_params=pltpu.CompilerParams(
            dimension_semantics=("parallel", "parallel"),
            vmem_limit_bytes=vmem_limit),
    )(conv_flat, scale, shift)

    out = y[:, :, :mimg].reshape(n, cout, h, wp2)[:, :, :, :w]
    umask = jnp.broadcast_to(update_mask, (n, cout, h, w)).astype(jnp.float32)
    return out, umask


# ---------------------------------------------------------------------------
# Pure-JAX reference mirroring the kernel's precision policy (bf16 conv operands,
# bf16-rounded conv intermediate, f32 statistics / BN apply).
# ---------------------------------------------------------------------------
def _reference(images, masks, weight, gamma, beta, eps=1e-5):
    xm = (images * masks).astype(jnp.bfloat16).astype(jnp.float32)
    wb = weight.astype(jnp.bfloat16).astype(jnp.float32)
    dn = lax.conv_dimension_numbers(images.shape, weight.shape, ('NCHW', 'OIHW', 'NCHW'))
    raw = lax.conv_general_dilated(xm, wb, (1, 1), [(1, 1), (1, 1)],
                                   dimension_numbers=dn, precision=lax.Precision.HIGHEST)
    um = lax.conv_general_dilated(masks, jnp.ones_like(weight), (1, 1), [(1, 1), (1, 1)],
                                  dimension_numbers=dn, precision=lax.Precision.HIGHEST)
    slide = float(weight.shape[1] * weight.shape[2] * weight.shape[3])
    ratio = slide / (um + 1e-8)
    umc = jnp.clip(um, 0.0, 1.0)
    out = raw * (ratio * umc)
    mean = out.mean(axis=(0, 2, 3), keepdims=True)
    var = jnp.square(out - mean).mean(axis=(0, 2, 3), keepdims=True)
    out_q = out.astype(jnp.bfloat16).astype(jnp.float32)   # bf16 conv intermediate
    yv = (out_q - mean) * lax.rsqrt(var + eps)
    yv = yv * gamma.reshape(1, -1, 1, 1) + beta.reshape(1, -1, 1, 1)
    return jnp.maximum(yv, 0.0), umc


if __name__ == "__main__":
    key = jax.random.PRNGKey(0)
    k1, k2, k3 = jax.random.split(key, 3)

    N, Cin, H, W = 2, 4, 32, 32
    Cout, K = 8, 3

    images = jax.random.normal(k1, (N, Cin, H, W), jnp.float32)
    masks = (jax.random.uniform(k2, (N, 1, H, W)) > 0.3).astype(jnp.float32)
    masks = jnp.broadcast_to(masks, (N, Cin, H, W)).astype(jnp.float32)

    # PyTorch-like uniform conv weight init; BN params at their defaults (bias=False module).
    bound = 1.0 / float(np.sqrt(Cin * K * K))
    weight = jax.random.uniform(k3, (Cout, Cin, K, K), jnp.float32, -bound, bound)
    gamma = jnp.ones((Cout,), jnp.float32)
    beta = jnp.zeros((Cout,), jnp.float32)

    fwd = jax.jit(pconv_bn_activ)
    out, umask = fwd(images, masks, weight, gamma, beta)
    out, umask = jax.block_until_ready((out, umask))

    ref_out, ref_umask = _reference(images, masks, weight, gamma, beta)
    np.testing.assert_allclose(np.asarray(umask), np.asarray(ref_umask),
                               rtol=1e-5, atol=1e-5)
    np.testing.assert_allclose(np.asarray(out), np.asarray(ref_out),
                               rtol=2e-3, atol=2e-3)

    print("KERNEL_OK")
</pallas_src>

<mosaic_0001>
module attributes {stable_mosaic.version = 11 : i64} {
  func.func @_bn_relu_kernel(%arg0: i32, %arg1: i32, %arg2: memref<1x8x1152xbf16, #tpu.memory_space<vmem>>, %arg3: memref<8x1xf32, #tpu.memory_space<vmem>>, %arg4: memref<8x1xf32, #tpu.memory_space<vmem>>, %arg5: memref<1x8x1152xf32, #tpu.memory_space<vmem>>) attributes {dimension_semantics = [#tpu.dimension_semantics<parallel>, #tpu.dimension_semantics<parallel>], iteration_bounds = array<i64: 2, 1>, scalar_prefetch = 0 : i64, scratch_operands = 0 : i64, tpu.core_type = #tpu.core_type<tc>, window_params = [{transform_indices = @transform_0, window_bounds = array<i64: 1, 8, 1152>}, {pipeline_mode = #tpu.pipeline_mode<synchronous>, transform_indices = @transform_1, window_bounds = array<i64: 8, 1>}, {pipeline_mode = #tpu.pipeline_mode<synchronous>, transform_indices = @transform_2, window_bounds = array<i64: 8, 1>}, {transform_indices = @transform_3, window_bounds = array<i64: 1, 8, 1152>}]} {
    %c0 = arith.constant 0 : index
    %c0_0 = arith.constant 0 : index
    %c0_1 = arith.constant 0 : index
    %0 = vector.load %arg2[%c0, %c0_0, %c0_1] : memref<1x8x1152xbf16, #tpu.memory_space<vmem>>, vector<1x8x1152xbf16>
    %1 = vector.shape_cast %0 : vector<1x8x1152xbf16> to vector<8x1152xbf16>
    %2 = arith.extf %1 : vector<8x1152xbf16> to vector<8x1152xf32>
    %c0_2 = arith.constant 0 : index
    %c0_3 = arith.constant 0 : index
    %3 = vector.load %arg3[%c0_2, %c0_3] : memref<8x1xf32, #tpu.memory_space<vmem>>, vector<8x1xf32>
    %4 = vector.broadcast %3 : vector<8x1xf32> to vector<8x1152xf32>
    %5 = arith.mulf %2, %4 : vector<8x1152xf32>
    %c0_4 = arith.constant 0 : index
    %c0_5 = arith.constant 0 : index
    %6 = vector.load %arg4[%c0_4, %c0_5] : memref<8x1xf32, #tpu.memory_space<vmem>>, vector<8x1xf32>
    %7 = vector.broadcast %6 : vector<8x1xf32> to vector<8x1152xf32>
    %8 = arith.addf %5, %7 : vector<8x1152xf32>
    %cst = arith.constant 0.000000e+00 : f32
    %9 = vector.broadcast %cst : f32 to vector<8x1152xf32>
    %10 = arith.maximumf %8, %9 : vector<8x1152xf32>
    %c0_6 = arith.constant 0 : index
    %c0_7 = arith.constant 0 : index
    %c0_8 = arith.constant 0 : index
    %11 = vector.load %arg5[%c0_6, %c0_7, %c0_8] : memref<1x8x1152xf32, #tpu.memory_space<vmem>>, vector<1x8x1152xf32>
    %12 = vector.shape_cast %11 : vector<1x8x1152xf32> to vector<8x1152xf32>
    %13 = vector.shape_cast %10 : vector<8x1152xf32> to vector<1x8x1152xf32>
    tpu.vector_store %arg5[%c0_6, %c0_7, %c0_8], %13 {strides = array<i32>} : memref<1x8x1152xf32, #tpu.memory_space<vmem>>, vector<1x8x1152xf32>,
    return
  }
  func.func @transform_0(%arg0: i32, %arg1: i32) -> (i32, i32, i32) {
    %c0_i32 = arith.constant 0 : i32
    %c0_i32_0 = arith.constant 0 : i32
    return %arg0, %c0_i32, %arg1 : i32, i32, i32
  }
  func.func @transform_1(%arg0: i32, %arg1: i32) -> (i32, i32) {
    %c0_i32 = arith.constant 0 : i32
    %c0_i32_0 = arith.constant 0 : i32
    %c0_i32_1 = arith.constant 0 : i32
    return %c0_i32, %c0_i32_0 : i32, i32
  }
  func.func @transform_2(%arg0: i32, %arg1: i32) -> (i32, i32) {
    %c0_i32 = arith.constant 0 : i32
    %c0_i32_0 = arith.constant 0 : i32
    %c0_i32_1 = arith.constant 0 : i32
    return %c0_i32, %c0_i32_0 : i32, i32
  }
  func.func @transform_3(%arg0: i32, %arg1: i32) -> (i32, i32, i32) {
    %c0_i32 = arith.constant 0 : i32
    %c0_i32_0 = arith.constant 0 : i32
    return %arg0, %c0_i32, %arg1 : i32, i32, i32
  }
}

module attributes {stable_mosaic.version = 11 : i64} {
  func.func @_pconv_stats_kernel(%arg0: i32, %arg1: memref<1x8x1280xf32, #tpu.memory_space<vmem>>, %arg2: memref<1x1x1152xf32, #tpu.memory_space<vmem>>, %arg3: memref<9x8x8xbf16, #tpu.memory_space<vmem>>, %arg4: memref<1x8x1152xbf16, #tpu.memory_space<vmem>>, %arg5: memref<1x8x1xf32, #tpu.memory_space<vmem>>, %arg6: memref<1x8x1xf32, #tpu.memory_space<vmem>>) attributes {dimension_semantics = [#tpu.dimension_semantics<parallel>], iteration_bounds = array<i64: 2>, scalar_prefetch = 0 : i64, scratch_operands = 0 : i64, tpu.core_type = #tpu.core_type<tc>, window_params = [{transform_indices = @transform_0, window_bounds = array<i64: 1, 8, 1280>}, {transform_indices = @transform_1, window_bounds = array<i64: 1, 1, 1152>}, {pipeline_mode = #tpu.pipeline_mode<synchronous>, transform_indices = @transform_2, window_bounds = array<i64: 9, 8, 8>}, {transform_indices = @transform_3, window_bounds = array<i64: 1, 8, 1152>}, {transform_indices = @transform_4, window_bounds = array<i64: 1, 8, 1>}, {transform_indices = @transform_5, window_bounds = array<i64: 1, 8, 1>}]} {
    %c0 = arith.constant 0 : index
    %c0_0 = arith.constant 0 : index
    %c0_1 = arith.constant 0 : index
    %0 = vector.load %arg1[%c0, %c0_0, %c0_1] : memref<1x8x1280xf32, #tpu.memory_space<vmem>>, vector<1x8x1280xf32>
    %1 = vector.shape_cast %0 : vector<1x8x1280xf32> to vector<8x1280xf32>
    %2 = arith.truncf %1 : vector<8x1280xf32> to vector<8x1280xbf16>
    %cst = arith.constant 0.000000e+00 : f32
    %3 = vector.broadcast %cst : f32 to vector<8x1152xf32>
    %4 = vector.extract_strided_slice %2 {offsets = [0, 0], sizes = [8, 1152], strides = [1, 1]} : vector<8x1280xbf16> to vector<8x1152xbf16>
    %c0_2 = arith.constant 0 : index
    %c0_3 = arith.constant 0 : index
    %c0_4 = arith.constant 0 : index
    %5 = vector.load %arg3[%c0_2, %c0_3, %c0_4] : memref<9x8x8xbf16, #tpu.memory_space<vmem>>, vector<1x8x8xbf16>
    %6 = vector.shape_cast %5 : vector<1x8x8xbf16> to vector<8x8xbf16>
    %cst_5 = arith.constant dense<0.000000e+00> : vector<8x1152xf32>
    %7 = tpu.matmul %6, %4, %cst_5 {dimension_numbers = #tpu.dot_dimension_numbers<[1], [0], [0], [1], [0, 0, 1, 1], [], []>} : vector<8x8xbf16>, vector<8x1152xbf16>, vector<8x1152xf32> -> vector<8x1152xf32>
    %8 = arith.addf %3, %7 : vector<8x1152xf32>
    %9 = vector.extract_strided_slice %2 {offsets = [0, 1], sizes = [8, 1152], strides = [1, 1]} : vector<8x1280xbf16> to vector<8x1152xbf16>
    %c1 = arith.constant 1 : index
    %c0_6 = arith.constant 0 : index
    %c0_7 = arith.constant 0 : index
    %10 = vector.load %arg3[%c1, %c0_6, %c0_7] : memref<9x8x8xbf16, #tpu.memory_space<vmem>>, vector<1x8x8xbf16>
    %11 = vector.shape_cast %10 : vector<1x8x8xbf16> to vector<8x8xbf16>
    %cst_8 = arith.constant dense<0.000000e+00> : vector<8x1152xf32>
    %12 = tpu.matmul %11, %9, %cst_8 {dimension_numbers = #tpu.dot_dimension_numbers<[1], [0], [0], [1], [0, 0, 1, 1], [], []>} : vector<8x8xbf16>, vector<8x1152xbf16>, vector<8x1152xf32> -> vector<8x1152xf32>
    %13 = arith.addf %8, %12 : vector<8x1152xf32>
    %14 = vector.extract_strided_slice %2 {offsets = [0, 2], sizes = [8, 1152], strides = [1, 1]} : vector<8x1280xbf16> to vector<8x1152xbf16>
    %c2 = arith.constant 2 : index
    %c0_9 = arith.constant 0 : index
    %c0_10 = arith.constant 0 : index
    %15 = vector.load %arg3[%c2, %c0_9, %c0_10] : memref<9x8x8xbf16, #tpu.memory_space<vmem>>, vector<1x8x8xbf16>
    %16 = vector.shape_cast %15 : vector<1x8x8xbf16> to vector<8x8xbf16>
    %cst_11 = arith.constant dense<0.000000e+00> : vector<8x1152xf32>
    %17 = tpu.matmul %16, %14, %cst_11 {dimension_numbers = #tpu.dot_dimension_numbers<[1], [0], [0], [1], [0, 0, 1, 1], [], []>} : vector<8x8xbf16>, vector<8x1152xbf16>, vector<8x1152xf32> -> vector<8x1152xf32>
    %18 = arith.addf %13, %17 : vector<8x1152xf32>
    %19 = vector.extract_strided_slice %2 {offsets = [0, 34], sizes = [8, 1152], strides = [1, 1]} : vector<8x1280xbf16> to vector<8x1152xbf16>
    %c3 = arith.constant 3 : index
    %c0_12 = arith.constant 0 : index
    %c0_13 = arith.constant 0 : index
    %20 = vector.load %arg3[%c3, %c0_12, %c0_13] : memref<9x8x8xbf16, #tpu.memory_space<vmem>>, vector<1x8x8xbf16>
    %21 = vector.shape_cast %20 : vector<1x8x8xbf16> to vector<8x8xbf16>
    %cst_14 = arith.constant dense<0.000000e+00> : vector<8x1152xf32>
    %22 = tpu.matmul %21, %19, %cst_14 {dimension_numbers = #tpu.dot_dimension_numbers<[1], [0], [0], [1], [0, 0, 1, 1], [], []>} : vector<8x8xbf16>, vector<8x1152xbf16>, vector<8x1152xf32> -> vector<8x1152xf32>
    %23 = arith.addf %18, %22 : vector<8x1152xf32>
    %24 = vector.extract_strided_slice %2 {offsets = [0, 35], sizes = [8, 1152], strides = [1, 1]} : vector<8x1280xbf16> to vector<8x1152xbf16>
    %c4 = arith.constant 4 : index
    %c0_15 = arith.constant 0 : index
    %c0_16 = arith.constant 0 : index
    %25 = vector.load %arg3[%c4, %c0_15, %c0_16] : memref<9x8x8xbf16, #tpu.memory_space<vmem>>, vector<1x8x8xbf16>
    %26 = vector.shape_cast %25 : vector<1x8x8xbf16> to vector<8x8xbf16>
    %cst_17 = arith.constant dense<0.000000e+00> : vector<8x1152xf32>
    %27 = tpu.matmul %26, %24, %cst_17 {dimension_numbers = #tpu.dot_dimension_numbers<[1], [0], [0], [1], [0, 0, 1, 1], [], []>} : vector<8x8xbf16>, vector<8x1152xbf16>, vector<8x1152xf32> -> vector<8x1152xf32>
    %28 = arith.addf %23, %27 : vector<8x1152xf32>
    %29 = vector.extract_strided_slice %2 {offsets = [0, 36], sizes = [8, 1152], strides = [1, 1]} : vector<8x1280xbf16> to vector<8x1152xbf16>
    %c5 = arith.constant 5 : index
    %c0_18 = arith.constant 0 : index
    %c0_19 = arith.constant 0 : index
    %30 = vector.load %arg3[%c5, %c0_18, %c0_19] : memref<9x8x8xbf16, #tpu.memory_space<vmem>>, vector<1x8x8xbf16>
    %31 = vector.shape_cast %30 : vector<1x8x8xbf16> to vector<8x8xbf16>
    %cst_20 = arith.constant dense<0.000000e+00> : vector<8x1152xf32>
    %32 = tpu.matmul %31, %29, %cst_20 {dimension_numbers = #tpu.dot_dimension_numbers<[1], [0], [0], [1], [0, 0, 1, 1], [], []>} : vector<8x8xbf16>, vector<8x1152xbf16>, vector<8x1152xf32> -> vector<8x1152xf32>
    %33 = arith.addf %28, %32 : vector<8x1152xf32>
    %34 = vector.extract_strided_slice %2 {offsets = [0, 68], sizes = [8, 1152], strides = [1, 1]} : vector<8x1280xbf16> to vector<8x1152xbf16>
    %c6 = arith.constant 6 : index
    %c0_21 = arith.constant 0 : index
    %c0_22 = arith.constant 0 : index
    %35 = vector.load %arg3[%c6, %c0_21, %c0_22] : memref<9x8x8xbf16, #tpu.memory_space<vmem>>, vector<1x8x8xbf16>
    %36 = vector.shape_cast %35 : vector<1x8x8xbf16> to vector<8x8xbf16>
    %cst_23 = arith.constant dense<0.000000e+00> : vector<8x1152xf32>
    %37 = tpu.matmul %36, %34, %cst_23 {dimension_numbers = #tpu.dot_dimension_numbers<[1], [0], [0], [1], [0, 0, 1, 1], [], []>} : vector<8x8xbf16>, vector<8x1152xbf16>, vector<8x1152xf32> -> vector<8x1152xf32>
    %38 = arith.addf %33, %37 : vector<8x1152xf32>
    %39 = vector.extract_strided_slice %2 {offsets = [0, 69], sizes = [8, 1152], strides = [1, 1]} : vector<8x1280xbf16> to vector<8x1152xbf16>
    %c7 = arith.constant 7 : index
    %c0_24 = arith.constant 0 : index
    %c0_25 = arith.constant 0 : index
    %40 = vector.load %arg3[%c7, %c0_24, %c0_25] : memref<9x8x8xbf16, #tpu.memory_space<vmem>>, vector<1x8x8xbf16>
    %41 = vector.shape_cast %40 : vector<1x8x8xbf16> to vector<8x8xbf16>
    %cst_26 = arith.constant dense<0.000000e+00> : vector<8x1152xf32>
    %42 = tpu.matmul %41, %39, %cst_26 {dimension_numbers = #tpu.dot_dimension_numbers<[1], [0], [0], [1], [0, 0, 1, 1], [], []>} : vector<8x8xbf16>, vector<8x1152xbf16>, vector<8x1152xf32> -> vector<8x1152xf32>
    %43 = arith.addf %38, %42 : vector<8x1152xf32>
    %44 = vector.extract_strided_slice %2 {offsets = [0, 70], sizes = [8, 1152], strides = [1, 1]} : vector<8x1280xbf16> to vector<8x1152xbf16>
    %c8 = arith.constant 8 : index
    %c0_27 = arith.constant 0 : index
    %c0_28 = arith.constant 0 : index
    %45 = vector.load %arg3[%c8, %c0_27, %c0_28] : memref<9x8x8xbf16, #tpu.memory_space<vmem>>, vector<1x8x8xbf16>
    %46 = vector.shape_cast %45 : vector<1x8x8xbf16> to vector<8x8xbf16>
    %cst_29 = arith.constant dense<0.000000e+00> : vector<8x1152xf32>
    %47 = tpu.matmul %46, %44, %cst_29 {dimension_numbers = #tpu.dot_dimension_numbers<[1], [0], [0], [1], [0, 0, 1, 1], [], []>} : vector<8x8xbf16>, vector<8x1152xbf16>, vector<8x1152xf32> -> vector<8x1152xf32>
    %48 = arith.addf %43, %47 : vector<8x1152xf32>
    %c0_30 = arith.constant 0 : index
    %c0_31 = arith.constant 0 : index
    %c0_32 = arith.constant 0 : index
    %49 = vector.load %arg2[%c0_30, %c0_31, %c0_32] : memref<1x1x1152xf32, #tpu.memory_space<vmem>>, vector<1x1x1152xf32>
    %50 = vector.shape_cast %49 : vector<1x1x1152xf32> to vector<1x1152xf32>
    %51 = vector.broadcast %50 : vector<1x1152xf32> to vector<8x1152xf32>
    %52 = arith.mulf %48, %51 : vector<8x1152xf32>
    %53 = arith.truncf %52 : vector<8x1152xf32> to vector<8x1152xbf16>
    %c0_33 = arith.constant 0 : index
    %c0_34 = arith.constant 0 : index
    %c0_35 = arith.constant 0 : index
    %54 = vector.load %arg4[%c0_33, %c0_34, %c0_35] : memref<1x8x1152xbf16, #tpu.memory_space<vmem>>, vector<1x8x1152xbf16>
    %55 = vector.shape_cast %54 : vector<1x8x1152xbf16> to vector<8x1152xbf16>
    %56 = vector.shape_cast %53 : vector<8x1152xbf16> to vector<1x8x1152xbf16>
    tpu.vector_store %arg4[%c0_33, %c0_34, %c0_35], %56 {strides = array<i32>} : memref<1x8x1152xbf16, #tpu.memory_space<vmem>>, vector<1x8x1152xbf16>,
    %cst_36 = arith.constant dense<0.000000e+00> : vector<8xf32>
    %57 = vector.multi_reduction <add>, %52, %cst_36 [1] : vector<8x1152xf32> to vector<8xf32>
    %58 = vector.shape_cast %57 : vector<8xf32> to vector<8x1xf32>
    %c0_37 = arith.constant 0 : index
    %c0_38 = arith.constant 0 : index
    %c0_39 = arith.constant 0 : index
    %59 = vector.load %arg5[%c0_37, %c0_38, %c0_39] : memref<1x8x1xf32, #tpu.memory_space<vmem>>, vector<1x8x1xf32>
    %60 = vector.shape_cast %59 : vector<1x8x1xf32> to vector<8x1xf32>
    %61 = vector.shape_cast %58 : vector<8x1xf32> to vector<1x8x1xf32>
    tpu.vector_store %arg5[%c0_37, %c0_38, %c0_39], %61 {strides = array<i32>} : memref<1x8x1xf32, #tpu.memory_space<vmem>>, vector<1x8x1xf32>,
    %62 = arith.mulf %52, %52 : vector<8x1152xf32>
    %cst_40 = arith.constant dense<0.000000e+00> : vector<8xf32>
    %63 = vector.multi_reduction <add>, %62, %cst_40 [1] : vector<8x1152xf32> to vector<8xf32>
    %64 = vector.shape_cast %63 : vector<8xf32> to vector<8x1xf32>
    %c0_41 = arith.constant 0 : index
    %c0_42 = arith.constant 0 : index
    %c0_43 = arith.constant 0 : index
    %65 = vector.load %arg6[%c0_41, %c0_42, %c0_43] : memref<1x8x1xf32, #tpu.memory_space<vmem>>, vector<1x8x1xf32>
    %66 = vector.shape_cast %65 : vector<1x8x1xf32> to vector<8x1xf32>
    %67 = vector.shape_cast %64 : vector<8x1xf32> to vector<1x8x1xf32>
    tpu.vector_store %arg6[%c0_41, %c0_42, %c0_43], %67 {strides = array<i32>} : memref<1x8x1xf32, #tpu.memory_space<vmem>>, vector<1x8x1xf32>,
    return
  }
  func.func @transform_0(%arg0: i32) -> (i32, i32, i32) {
    %c0_i32 = arith.constant 0 : i32
    %c0_i32_0 = arith.constant 0 : i32
    %c0_i32_1 = arith.constant 0 : i32
    return %arg0, %c0_i32, %c0_i32_0 : i32, i32, i32
  }
  func.func @transform_1(%arg0: i32) -> (i32, i32, i32) {
    %c0_i32 = arith.constant 0 : i32
    %c0_i32_0 = arith.constant 0 : i32
    %c0_i32_1 = arith.constant 0 : i32
    return %arg0, %c0_i32, %c0_i32_0 : i32, i32, i32
  }
  func.func @transform_2(%arg0: i32) -> (i32, i32, i32) {
    %c0_i32 = arith.constant 0 : i32
    %c0_i32_0 = arith.constant 0 : i32
    %c0_i32_1 = arith.constant 0 : i32
    %c0_i32_2 = arith.constant 0 : i32
    return %c0_i32, %c0_i32_0, %c0_i32_1 : i32, i32, i32
  }
  func.func @transform_3(%arg0: i32) -> (i32, i32, i32) {
    %c0_i32 = arith.constant 0 : i32
    %c0_i32_0 = arith.constant 0 : i32
    %c0_i32_1 = arith.constant 0 : i32
    return %arg0, %c0_i32, %c0_i32_0 : i32, i32, i32
  }
  func.func @transform_4(%arg0: i32) -> (i32, i32, i32) {
    %c0_i32 = arith.constant 0 : i32
    %c0_i32_0 = arith.constant 0 : i32
    %c0_i32_1 = arith.constant 0 : i32
    return %arg0, %c0_i32, %c0_i32_0 : i32, i32, i32
  }
  func.func @transform_5(%arg0: i32) -> (i32, i32, i32) {
    %c0_i32 = arith.constant 0 : i32
    %c0_i32_0 = arith.constant 0 : i32
    %c0_i32_1 = arith.constant 0 : i32
    return %arg0, %c0_i32, %c0_i32_0 : i32, i32, i32
  }
}

</mosaic_0001>

<bundles_post_ra>
// kernel: pconv_bn_activ.3
= control target key start
LH: loop header
LB: loop body
LE: loop exit
PB: predicated region body
PF: predicated region fallthrough
CT: control target
= control target key end

     0   :  { %s441_s12 = smov 0   ;;  %s443_s13 = smov 0   ;;  %s484_s0 = inlined_call_operand.vmem [shape: bf16[2,8,1152], index: 0, kind: input, shape index: {}]   ;;  %s485_s1 = inlined_call_operand.vmem [shape: f32[8,1], index: 1, kind: input, shape index: {}]   ;;  %s486_s2 = inlined_call_operand.vmem [shape: f32[8,1], index: 2, kind: input, shape index: {}]   ;;  %s487_s3 = inlined_call_operand.vmem [shape: f32[2,8,1152], index: 3, kind: output, shape index: {}]  }
   0x1   :  { %s445_s14 = smov 0  }
   0x2 LB: > { %s25_s15 = sadd.s32 1, %s414_s13  ;;  %p363_p0 = scmp.ge.s32.totalorder %s418_s14, 1  ;;  %s418_s14 = sphi %s445_s14, %s13_s14   ;;  %s414_s13 = sphi %s443_s13, %s489_s13   ;;  %s410_s12 = sphi %s441_s12, %s488_s12  }
   0x3   : > { %p27_p1 = scmp.ge.s32.totalorder %s25_s15, 2  ;;  %p158_p2 = scmp.lt.s32.totalorder %s418_s14, 3 }
   0x5   : > { %s491_s15 = smov (%p27_p1, %s25_s15), 0  ;;  %p159_p3 = pnand %p363_p0, %p158_p2 }
   0x6   : > { %v224_v0 = vld [vmem:[%s485_s1] sm:$0xff] (!%p159_p3)  ;;  %v420_v1 = vmov (!%p159_p3), 0   ;;  %p191_p4 = scmp.lt.s32.totalorder (!%p159_p3), %s410_s12, 1 }
   0x7   : > { %162 = sbr.rel (%p159_p3) target bundleno = 149 (0x95), region = 32  ;;  %395 = vset.pattern.permute.xlu0 (!%p159_p3), %v420_v1  ;;  %v239_v2 = vld [vmem:[%s486_s2] sm:$0xff] (!%p159_p3) }
   0x8   : > { %227 = vperm.xlu0 (!%p159_p3), %395, %v224_v0  }
   0xc   : > { %242 = vperm.xlu0 (!%p159_p3), %395, %v239_v2  }
   0xe   : > { %s493_s12 = smov (!%p191_p4, %s410_s12), 1 }
   0xf   : > { %s368_s20 = smul.u32 36, %s493_s12 }
  0x10   : > { %s369_s24 = smul.u32 72, %s493_s12 }
  0x11   : > { %s198_s23 = scalar_lea.vmem %s484_s0, %s368_s20 }
  0x12   : > { %v210_v3 = vld [vmem:[%s198_s23] sm:$0xff]  ;;  %v211_v4 = vld [vmem:[%s198_s23 + $0x8] sm:$0xff]  ;;  %v212_v5 = vld [vmem:[%s198_s23 + $0x10] sm:$0xff]  ;;  %s208_s27 = scalar_lea.vmem %s487_s3, %s369_s24 }
  0x13   : > { %v213_v6 = vld [vmem:[%s198_s23 + $0x18] sm:$0xff]  ;;  %v214_v7 = vld [vmem:[%s198_s23 + $0x20] sm:$0xf]  ;;  %v215_v8 = vunpack.c.l.bf16 %v210_v3  ;;  %v216_v9 = vunpack.c.h.bf16 %v210_v3  ;;  %v217_v10 = vunpack.c.l.bf16 %v211_v4  ;;  %v218_v11 = vunpack.c.h.bf16 %v211_v4 }
  0x14   : > { %v219_v12 = vunpack.c.l.bf16 %v212_v5  ;;  %v220_v14 = vunpack.c.h.bf16 %v212_v5  ;;  %v221_v15 = vunpack.c.l.bf16 %v213_v6  ;;  %v222_v16 = vunpack.c.h.bf16 %v213_v6 }
  0x15   : > { %v223_v17 = vunpack.c.l.bf16 %v214_v7 }
  0x87   : > { %v228_v13 = vpop.permute.xlu0 %227 }
  0x88   : > { %v230_v18 = vmul.f32 %v228_v13, %v215_v8  ;;  %v231_v19 = vmul.f32 %v228_v13, %v216_v9  ;;  %v232_v20 = vmul.f32 %v228_v13, %v217_v10  ;;  %v233_v21 = vmul.f32 %v228_v13, %v218_v11 }
  0x89   : > { %v234_v22 = vmul.f32 %v228_v13, %v219_v12  ;;  %v235_v24 = vmul.f32 %v228_v13, %v220_v14  ;;  %v236_v25 = vmul.f32 %v228_v13, %v221_v15  ;;  %v237_v26 = vmul.f32 %v228_v13, %v222_v16 }
  0x8a   : > { %v238_v27 = vmul.f32 %v228_v13, %v223_v17 }
  0x8b   : > { %v243_v23 = vpop.permute.xlu0 %242 }
  0x8c   : > { %v245_v28 = vadd.f32 %v243_v23, %v230_v18  ;;  %v246_v29 = vadd.f32 %v243_v23, %v231_v19  ;;  %v247_v30 = vadd.f32 %v243_v23, %v232_v20  ;;  %v248_v31 = vadd.f32 %v243_v23, %v233_v21 }
  0x8d   : > { %v249_v32 = vadd.f32 %v243_v23, %v234_v22  ;;  %v250_v33 = vadd.f32 %v243_v23, %v235_v24  ;;  %v251_v34 = vadd.f32 %v243_v23, %v236_v25  ;;  %v252_v35 = vadd.f32 %v243_v23, %v237_v26 }
  0x8e   : > { %v253_v36 = vadd.f32 %v243_v23, %v238_v27  ;;  %v254_v37 = vmax.f32 %v245_v28, 0.0  ;;  %v255_v38 = vmax.f32 %v246_v29, 0.0  ;;  %v256_v39 = vmax.f32 %v247_v30, 0.0 }
  0x8f   : > { %v257_v40 = vmax.f32 %v248_v31, 0.0  ;;  %v258_v41 = vmax.f32 %v249_v32, 0.0  ;;  %v259_v42 = vmax.f32 %v250_v33, 0.0  ;;  %v260_v43 = vmax.f32 %v251_v34, 0.0 }
  0x90   : > { %v261_v44 = vmax.f32 %v252_v35, 0.0  ;;  %v262_v45 = vmax.f32 %v253_v36, 0.0  ;;  %263 = vst [vmem:[%s208_s27] sm:$0xff] %v254_v37  ;;  %264 = vst [vmem:[%s208_s27 + $0x8] sm:$0xff] %v255_v38 }
  0x91   : > { %265 = vst [vmem:[%s208_s27 + $0x10] sm:$0xff] %v256_v39  ;;  %266 = vst [vmem:[%s208_s27 + $0x18] sm:$0xff] %v257_v40 }
  0x92   : > { %267 = vst [vmem:[%s208_s27 + $0x20] sm:$0xff] %v258_v41  ;;  %268 = vst [vmem:[%s208_s27 + $0x28] sm:$0xff] %v259_v42 }
  0x93   : > { %269 = vst [vmem:[%s208_s27 + $0x30] sm:$0xff] %v260_v43  ;;  %270 = vst [vmem:[%s208_s27 + $0x38] sm:$0xff] %v261_v44 }
  0x94   : > { %271 = vst [vmem:[%s208_s27 + $0x40] sm:$0xff] %v262_v45 }
  0x95 PF: > { %s13_s14 = sadd.s32 1, %s418_s14   ;;  %s488_s12 = smov %s414_s13 }
  0x96   : > { %p10_p5 = scmp.ge.s32.totalorder %s13_s14, 4   ;;  %s489_s13 = smov %s491_s15 }
  0x98   :  { %12 = sbr.rel (!%p10_p5) target bundleno = 2 (0x2), region = 62 }

// kernel: pconv_bn_activ.2
= control target key start
LH: loop header
LB: loop body
LE: loop exit
PB: predicated region body
PF: predicated region fallthrough
CT: control target
= control target key end

     0   :  { %s3390_s18 = smov 0   ;;  %s4003_s0 = inlined_call_operand.vmem [shape: f32[2,8,1280], index: 0, kind: input, shape index: {}]   ;;  %s4004_s1 = inlined_call_operand.vmem [shape: f32[2,1,1152], index: 1, kind: input, shape index: {}]   ;;  %s4005_s2 = inlined_call_operand.vmem [shape: bf16[9,8,8], index: 2, kind: input, shape index: {}]   ;;  %s4006_s3 = inlined_call_operand.vmem [shape: bf16[2,8,1152], index: 3, kind: output, shape index: {0}]   ;;  %s4007_s4 = inlined_call_operand.vmem [shape: f32[2,8,1], index: 4, kind: output, shape index: {1}]   ;;  %s4008_s5 = inlined_call_operand.vmem [shape: f32[2,8,1], index: 5, kind: output, shape index: {2}]  }
   0x1 LB: > { %s2983_s19 = sadd.s32 4294967295, %s3347_s18   ;;  %p2987_p0 = scmp.ge.s32.totalorder %s3347_s18, 1  ;;  %s3347_s18 = sphi %s3390_s18, %s16_s18  }
   0x2   : > { %p201_p1 = scmp.lt.s32.totalorder %s3347_s18, 3 }
   0x4   : > { %p202_p2 = pnand %p2987_p0, %p201_p1 }
   0x5   : > { %p241_p3 = scmp.lt.s32.totalorder (!%p202_p2), %s2983_s19, 1  ;;  %v3349_v0 = vmov (!%p202_p2), 0   ;;  %vm331_vm0 = vcmask (!%p202_p2), 1043456   ;;  %s3350_s24 = smov (!%p202_p2), 127   ;;  %v3440_v16 = vld [vmem:[%s4005_s2] sm:$0xf] (!%p202_p2) }
   0x6   : > { %205 = sbr.rel (%p202_p2) target bundleno = 679 (0x2a7), region = 32  ;;  %707 = vmatprep.mubr.bf16.mxu0 (!%p202_p2), %v3349_v0  ;;  %391 = vmatprep.mubr.bf16.mxu1 (!%p202_p2), %v3349_v0  ;;  %vm327_vm1 = vcmask (!%p202_p2), 64512   ;;  %v3351_v18 = vmov (!%p202_p2), 0.0   ;;  %vm3352_vm2 = vmmov (!%p202_p2), 0   ;;  %s3353_s27 = smov (!%p202_p2), 126   ;;  %vm317_vm3 = vcmask (!%p202_p2), 1039360  }
   0x7   : > { %s3354_s28 = smov (!%p202_p2), 94   ;;  %s3355_s29 = smov (!%p202_p2), 93   ;;  %v3556_v32 = vld [vmem:[%s4005_s2 + $0x4] sm:$0xf] (!%p202_p2)  ;;  %vm819_vm4 = vcmask (!%p202_p2), 1031168   ;;  %vm1094_vm5 = vcmask (!%p202_p2), 769024  }
   0x8   : > { %s3356_s30 = smov (!%p202_p2), 92   ;;  %s3357_s6 = smov (!%p202_p2), 60   ;;  %v3587_v47 = vld [vmem:[%s4005_s2 + $0x8] sm:$0xf] (!%p202_p2)  ;;  %vm1369_vm6 = vcmask (!%p202_p2), 760832   ;;  %vm1644_vm7 = vcmask (!%p202_p2), 752640  }
   0x9   : > { %s3358_s7 = smov (!%p202_p2), 59   ;;  %s3359_s12 = smov (!%p202_p2), 58   ;;  %vm1919_vm8 = vcmask (!%p202_p2), 490496   ;;  %vm2194_vm9 = vcmask (!%p202_p2), 482304   ;;  %vm2469_vm10 = vcmask (!%p202_p2), 474112   ;;  %vm2832_vm11 = vcmask (!%p202_p2), 7168  }
   0xd   : > { %s4010_s19 = smov (!%p241_p3, %s2983_s19), 1 }
   0xe   : > { %s3319_s20 = smul.u32 80, %s4010_s19  ;;  %s2990_s10 = sshll.u32 %s4010_s19, 3 }
   0xf   : > { %s258_s13 = scalar_lea.vmem %s4007_s4, %s2990_s10  ;;  %s262_s16 = scalar_lea.vmem %s4008_s5, %s2990_s10 }
  0x10   : > { %s3406_s23 = scalar_lea.vmem %s4003_s0, %s3319_s20 }
  0x11   : > { %v266_v1 = vld [vmem:[%s3406_s23 + $0x10] sm:$0xff]  ;;  %v264_v2 = vld [vmem:[%s3406_s23] sm:$0xff]  ;;  %v267_v3 = vld [vmem:[%s3406_s23 + $0x18] sm:$0xff] }
  0x12   : > { %v3411_v4 = vpack.c.bf16 %v266_v1, %v266_v1  ;;  %v3413_v5 = vpack.c.bf16 %v264_v2, %v264_v2  ;;  %v265_v6 = vld [vmem:[%s3406_s23 + $0x8] sm:$0xff]  ;;  %v268_v7 = vld [vmem:[%s3406_s23 + $0x20] sm:$0xff]  ;;  %v3425_v11 = vpack.c.bf16 %v267_v3, %v267_v3  ;;  %v270_v19 = vld [vmem:[%s3406_s23 + $0x30] sm:$0xff] }
  0x13   : > { %v3417_v8 = vpack.c.bf16 %v268_v7, %v268_v7  ;;  %v269_v9 = vld [vmem:[%s3406_s23 + $0x28] sm:$0xff]  ;;  %v272_v10 = vld [vmem:[%s3406_s23 + $0x40] sm:$0xff]  ;;  %v3427_v12 = vpack.c.bf16 %v265_v6, %v265_v6  ;;  %v3462_v20 = vpack.c.bf16 %v270_v19, %v270_v19  ;;  %v271_v21 = vld [vmem:[%s3406_s23 + $0x38] sm:$0xff] }
  0x14   : > { %301 = vrot.lane.b32.xlu1 %v3411_v4, %s3350_s24  ;;  %297 = vrot.lane.b32.xlu0 %v3413_v5, %s3350_s24  ;;  %v3429_v13 = vpack.c.bf16 %v269_v9, %v269_v9  ;;  %v3433_v15 = vpack.c.bf16 %v272_v10, %v272_v10  ;;  %v3476_v22 = vpack.c.bf16 %v271_v21, %v271_v21  ;;  %v273_v23 = vld [vmem:[%s3406_s23 + $0x48] sm:$0xff] }
  0x15   : > { %v579_v14 = vsel %vm331_vm0, %v3417_v8, 0  ;;  %v3487_v24 = vpack.c.bf16 %v273_v23, %v273_v23 }
  0x16   : > { %3006 = vmatprep.subr.msk.bf16.mxu0 %vm331_vm0, %v3429_v13  ;;  %v591_v17 = vsel %vm331_vm0, %v3433_v15, 0 }
  0x17   : > { %676 = vmatpush1.bf16.msra.mxu0 %v579_v14 }
  0x18   : > { %303 = vrot.lane.b32.xlu1 %v3425_v11, %s3350_s24  ;;  %299 = vrot.lane.b32.xlu0 %v3427_v12, %s3350_s24 }
  0x19   : > { %3118 = vmatprep.subr.bf16.mxu0 %v3351_v18 }
  0x1a   : > { %3007 = vmatmul.mubr.msk.bf16.vlgmr.msra.gmra.mrb[0].mxu0 %vm327_vm1, %v3440_v16 }
  0x1b   : > { %3119 = vmatpush3.bf16.msra.mxu0 %v591_v17  ;;  %3120 = vmatprep.mubr.msk.bf16.mxu0 %vm3352_vm2, %v3351_v18 }
  0x1c   : > { %799 = vrot.lane.b32.xlu1 %v3413_v5, %s3353_s27  ;;  %305 = vrot.lane.b32.xlu0 %v3417_v8, %s3350_s24 }
  0x20   : > { %803 = vrot.lane.b32.xlu1 %v3411_v4, %s3353_s27  ;;  %801 = vrot.lane.b32.xlu0 %v3427_v12, %s3353_s27 }
  0x22   : > { %3121 = vmatmul.mubr.msk.bf16.vlgmr.msra.gmra.mrb[4].mxu0 %vm327_vm1, %v3440_v16 }
  0x23   : > { %891 = vmatprep.mubr.bf16.mxu0 %v3349_v0 }
  0x24   : > { %309 = vrot.lane.b32.xlu1 %v3462_v20, %s3350_s24  ;;  %307 = vrot.lane.b32.xlu0 %v3429_v13, %s3350_s24 }
  0x28   : > { %809 = vrot.lane.b32.xlu1 %v3429_v13, %s3353_s27  ;;  %807 = vrot.lane.b32.xlu0 %v3417_v8, %s3353_s27 }
  0x2c   : > { %311 = vrot.lane.b32.xlu1 %v3476_v22, %s3350_s24  ;;  %811 = vrot.lane.b32.xlu0 %v3462_v20, %s3353_s27 }
  0x30   : > { %815 = vrot.lane.b32.xlu1 %v3433_v15, %s3353_s27  ;;  %313 = vrot.lane.b32.xlu0 %v3433_v15, %s3350_s24 }
  0x34   : > { %315 = vrot.lane.b32.xlu1 %v3487_v24, %s3350_s24  ;;  %817 = vrot.lane.b32.xlu0 %v3487_v24, %s3353_s27 }
  0x38   : > { %1076 = vrot.lane.b32.xlu1 %v3427_v12, %s3354_s28  ;;  %1074 = vrot.lane.b32.xlu0 %v3413_v5, %s3354_s28 }
  0x3c   : > { %1082 = vrot.lane.b32.xlu1 %v3417_v8, %s3354_s28  ;;  %1078 = vrot.lane.b32.xlu0 %v3411_v4, %s3354_s28 }
  0x40   : > { %1086 = vrot.lane.b32.xlu1 %v3462_v20, %s3354_s28  ;;  %1084 = vrot.lane.b32.xlu0 %v3429_v13, %s3354_s28 }
  0x44   : > { %1092 = vrot.lane.b32.xlu1 %v3487_v24, %s3354_s28  ;;  %1090 = vrot.lane.b32.xlu0 %v3433_v15, %s3354_s28 }
  0x48   : > { %1351 = vrot.lane.b32.xlu1 %v3427_v12, %s3355_s29  ;;  %1349 = vrot.lane.b32.xlu0 %v3413_v5, %s3355_s29 }
  0x4c   : > { %805 = vrot.lane.b32.xlu1 %v3425_v11, %s3353_s27  ;;  %1353 = vrot.lane.b32.xlu0 %v3411_v4, %s3355_s29 }
  0x50   : > { %1359 = vrot.lane.b32.xlu1 %v3429_v13, %s3355_s29  ;;  %1357 = vrot.lane.b32.xlu0 %v3417_v8, %s3355_s29 }
  0x54   : > { %813 = vrot.lane.b32.xlu1 %v3476_v22, %s3353_s27  ;;  %1361 = vrot.lane.b32.xlu0 %v3462_v20, %s3355_s29  ;;  %s3320_s27 = smul.u32 9, %s4010_s19 }
  0x58   : > { %1367 = vrot.lane.b32.xlu1 %v3487_v24, %s3355_s29  ;;  %1365 = vrot.lane.b32.xlu0 %v3433_v15, %s3355_s29 }
  0x5c   : > { %1624 = vrot.lane.b32.xlu1 %v3413_v5, %s3356_s30  ;;  %1080 = vrot.lane.b32.xlu0 %v3425_v11, %s3354_s28 }
  0x60   : > { %1628 = vrot.lane.b32.xlu1 %v3411_v4, %s3356_s30  ;;  %1626 = vrot.lane.b32.xlu0 %v3427_v12, %s3356_s30 }
  0x64   : > { %1632 = vrot.lane.b32.xlu1 %v3417_v8, %s3356_s30  ;;  %1088 = vrot.lane.b32.xlu0 %v3476_v22, %s3354_s28 }
  0x68   : > { %1636 = vrot.lane.b32.xlu1 %v3462_v20, %s3356_s30  ;;  %1634 = vrot.lane.b32.xlu0 %v3429_v13, %s3356_s30 }
  0x6c   : > { %1640 = vrot.lane.b32.xlu1 %v3433_v15, %s3356_s30  ;;  %1355 = vrot.lane.b32.xlu0 %v3425_v11, %s3355_s29 }
  0x70   : > { %1363 = vrot.lane.b32.xlu1 %v3476_v22, %s3355_s29  ;;  %1642 = vrot.lane.b32.xlu0 %v3487_v24, %s3356_s30 }
  0x74   : > { %1901 = vrot.lane.b32.xlu1 %v3427_v12, %s3357_s6  ;;  %1899 = vrot.lane.b32.xlu0 %v3413_v5, %s3357_s6 }
  0x78   : > { %1630 = vrot.lane.b32.xlu1 %v3425_v11, %s3356_s30  ;;  %1903 = vrot.lane.b32.xlu0 %v3411_v4, %s3357_s6 }
  0x7c   : > { %1909 = vrot.lane.b32.xlu1 %v3429_v13, %s3357_s6  ;;  %1907 = vrot.lane.b32.xlu0 %v3417_v8, %s3357_s6 }
  0x80   : > { %1638 = vrot.lane.b32.xlu1 %v3476_v22, %s3356_s30  ;;  %1911 = vrot.lane.b32.xlu0 %v3462_v20, %s3357_s6  ;;  %s3976_s30 = scalar_lea.vmem %s4004_s1, %s3320_s27 }
  0x84   : > { %1915 = vrot.lane.b32.xlu0 %v3433_v15, %s3357_s6  ;;  %1917 = vrot.lane.b32.xlu1 %v3487_v24, %s3357_s6 }
  0x86   : > { %v302_v25 = vpop.permute.xlu1 %301  ;;  %v298_v26 = vpop.permute.xlu0 %297 }
  0x88   : > { %1905 = vrot.lane.b32.xlu0 %v3425_v11, %s3357_s6  ;;  %2174 = vrot.lane.b32.xlu1 %v3413_v5, %s3358_s7 }
  0x8a   : > { %v304_v27 = vpop.permute.xlu1 %303  ;;  %v300_v28 = vpop.permute.xlu0 %299 }
  0x8b   : > { %v319_v29 = vsel %vm317_vm3, %v300_v28, %v302_v25  ;;  %v318_v30 = vsel %vm317_vm3, %v298_v26, %v300_v28  ;;  %v320_v33 = vsel %vm317_vm3, %v302_v25, %v304_v27 }
  0x8c   : > { %2176 = vrot.lane.b32.xlu0 %v3427_v12, %s3358_s7  ;;  %2993 = vmatprep.subr.msk.bf16.mxu1 %vm331_vm0, %v319_v29  ;;  %v333_v31 = vsel %vm331_vm0, %v318_v30, 0  ;;  %v339_v37 = vsel %vm331_vm0, %v320_v33, 0 }
  0x8d   : > { %360 = vmatpush1.bf16.msra.mxu1 %v333_v31  ;;  %2178 = vrot.lane.b32.xlu1 %v3411_v4, %s3358_s7  ;;  %v585_v31 = vsel %vm331_vm0, %v3462_v20, 0 }
  0x8e   : > { %v800_v34 = vpop.permute.xlu1 %799  ;;  %v306_v35 = vpop.permute.xlu0 %305 }
  0x8f   : > { %v321_v36 = vsel %vm317_vm3, %v304_v27, %v306_v35  ;;  %v573_v27 = vsel %vm331_vm0, %v3411_v4, 0 }
  0x90   : > { %1913 = vrot.lane.b32.xlu0 %v3476_v22, %s3357_s6  ;;  %2994 = vmatmul.mubr.msk.bf16.vlgmr.msra.gmra.mrb[0].mxu1 %vm327_vm1, %v3556_v32  ;;  %s3321_s6 = smul.u32 36, %s4010_s19 }
  0x91   : > { %2995 = vmatprep.subr.msk.bf16.mxu1 %vm331_vm0, %v321_v36  ;;  %432 = vmatprep.mubr.bf16.mxu1 %v3349_v0 }
  0x92   : > { %401 = vmatpush1.bf16.msra.mxu1 %v339_v37  ;;  %v3569_v38 = vpop.permute.xlu1 %803  ;;  %v802_v39 = vpop.permute.xlu0 %801  ;;  %2182 = vrot.lane.b32.xlu1 %v3417_v8, %s3358_s7  ;;  %s3983_s9 = scalar_lea.vmem %s4006_s3, %s3321_s6 }
  0x93   : > { %v820_v40 = vsel %vm819_vm4, %v800_v34, %v802_v39  ;;  %v821_v41 = vsel %vm819_vm4, %v802_v39, %v3569_v38 }
  0x94   : > { %v833_v42 = vsel %vm331_vm0, %v820_v40, 0  ;;  %3012 = vmatprep.subr.msk.bf16.mxu0 %vm331_vm0, %v821_v41  ;;  %2184 = vrot.lane.b32.xlu0 %v3429_v13, %s3358_s7 }
  0x95   : > { %860 = vmatpush1.bf16.msra.mxu0 %v833_v42 }
  0x96   : > { %v310_v43 = vpop.permute.xlu1 %309  ;;  %v308_v44 = vpop.permute.xlu0 %307  ;;  %2186 = vrot.lane.b32.xlu1 %v3462_v20, %s3358_s7 }
  0x97   : > { %v322_v45 = vsel %vm317_vm3, %v306_v35, %v308_v44  ;;  %v323_v46 = vsel %vm317_vm3, %v308_v44, %v310_v43 }
  0x98   : > { %v345_v48 = vsel %vm331_vm0, %v322_v45, 0  ;;  %2996 = vmatmul.mubr.msk.bf16.vlgmr.msra.gmra.mrb[4].mxu1 %vm327_vm1, %v3556_v32  ;;  %2997 = vmatprep.subr.msk.bf16.mxu1 %vm331_vm0, %v323_v46 }
  0x99   : > { %442 = vmatpush1.bf16.msra.mxu1 %v345_v48  ;;  %2180 = vrot.lane.b32.xlu0 %v3425_v11, %s3358_s7 }
  0x9a   : > { %v810_v49 = vpop.permute.xlu1 %809  ;;  %v3595_v50 = vpop.permute.xlu0 %807  ;;  %3013 = vmatmul.mubr.msk.bf16.vlgmr.msra.gmra.mrb[8].mxu0 %vm327_vm1, %v3587_v47  ;;  %473 = vmatprep.mubr.bf16.mxu1 %v3349_v0 }
  0x9b   : > { %2190 = vrot.lane.b32.xlu1 %v3433_v15, %s3358_s7  ;;  %973 = vmatprep.mubr.bf16.mxu0 %v3349_v0  ;;  %v824_v51 = vsel %vm819_vm4, %v3595_v50, %v810_v49 }
  0x9c   : > { %v845_v55 = vsel %vm331_vm0, %v824_v51, 0 }
  0x9d   : > { %2192 = vrot.lane.b32.xlu0 %v3487_v24, %s3358_s7 }
  0x9e   : > { %v312_v52 = vpop.permute.xlu1 %311  ;;  %v3607_v53 = vpop.permute.xlu0 %811 }
  0x9f   : > { %v825_v54 = vsel %vm819_vm4, %v810_v49, %v3607_v53  ;;  %2188 = vrot.lane.b32.xlu1 %v3476_v22, %s3358_s7  ;;  %v324_v56 = vsel %vm317_vm3, %v310_v43, %v312_v52 }
  0xa0   : > { %2998 = vmatmul.mubr.msk.bf16.vlgmr.msra.gmra.mrb[8].mxu1 %vm327_vm1, %v3556_v32  ;;  %3016 = vmatprep.subr.msk.bf16.mxu0 %vm331_vm0, %v825_v54  ;;  %v351_v60 = vsel %vm331_vm0, %v324_v56, 0 }
  0xa1   : > { %942 = vmatpush1.bf16.msra.mxu0 %v845_v55  ;;  %514 = vmatprep.mubr.bf16.mxu1 %v3349_v0 }
  0xa2   : > { %v3619_v57 = vpop.permute.xlu1 %815  ;;  %v314_v58 = vpop.permute.xlu0 %313  ;;  %3124 = vmatprep.subr.bf16.mxu0 %v3351_v18  ;;  %2449 = vrot.lane.b32.xlu0 %v3413_v5, %s3359_s12 }
  0xa3   : > { %v325_v59 = vsel %vm317_vm3, %v312_v52, %v314_v58  ;;  %2451 = vrot.lane.b32.xlu1 %v3427_v12, %s3359_s12 }
  0xa4   : > { %2999 = vmatprep.subr.msk.bf16.mxu1 %vm331_vm0, %v325_v59  ;;  %3017 = vmatmul.mubr.msk.bf16.vlgmr.msra.gmra.mrb[0].mxu0 %vm327_vm1, %v3587_v47 }
  0xa5   : > { %483 = vmatpush1.bf16.msra.mxu1 %v351_v60  ;;  %3126 = vmatprep.mubr.msk.bf16.mxu0 %vm3352_vm2, %v3351_v18 }
  0xa6   : > { %v316_v61 = vpop.permute.xlu1 %315  ;;  %v818_v62 = vpop.permute.xlu0 %817  ;;  %3112 = vmatprep.subr.bf16.mxu1 %v3351_v18  ;;  %2453 = vrot.lane.b32.xlu0 %v3411_v4, %s3359_s12 }
  0xa7   : > { %v326_v63 = vsel %vm317_vm3, %v314_v58, %v316_v61  ;;  %v828_v1 = vsel %vm819_vm4, %v3619_v57, %v818_v62  ;;  %2455 = vrot.lane.b32.xlu1 %v3425_v11, %s3359_s12 }
  0xa8   : > { %v357_v2 = vsel %vm331_vm0, %v326_v63, 0  ;;  %v857_v3 = vsel %vm331_vm0, %v828_v1, 0  ;;  %3000 = vmatmul.mubr.msk.bf16.vlgmr.msra.gmra.mrb[12].mxu1 %vm327_vm1, %v3556_v32 }
  0xa9   : > { %3113 = vmatpush3.bf16.msra.mxu1 %v357_v2  ;;  %3125 = vmatpush3.bf16.msra.mxu0 %v857_v3 }
  0xaa   : > { %v1077_v6 = vpop.permute.xlu1 %1076  ;;  %v1075_v7 = vpop.permute.xlu0 %1074  ;;  %3114 = vmatprep.mubr.msk.bf16.mxu1 %vm3352_vm2, %v3351_v18  ;;  %2457 = vrot.lane.b32.xlu0 %v3417_v8, %s3359_s12  ;;  %v567_v8 = vsel %vm331_vm0, %v3413_v5, 0  ;;  %v3676_v5 = vld [vmem:[%s4005_s2 + $0xc] sm:$0xf] }
  0xab   : > { %3002 = vmatprep.subr.msk.bf16.mxu1 %vm331_vm0, %v3427_v12  ;;  %2459 = vrot.lane.b32.xlu1 %v3429_v13, %s3359_s12  ;;  %v1095_v9 = vsel %vm1094_vm5, %v1075_v7, %v1077_v6 }
  0xac   : > { %3127 = vmatmul.mubr.msk.bf16.vlgmr.msra.gmra.mrb[4].mxu0 %vm327_vm1, %v3587_v47  ;;  %v1108_v13 = vsel %vm331_vm0, %v1095_v9, 0 }
  0xad   : > { %1166 = vmatprep.mubr.bf16.mxu0 %v3349_v0 }
  0xae   : > { %v3657_v10 = vpop.permute.xlu1 %1082  ;;  %v3659_v14 = vpop.permute.xlu0 %1078  ;;  %2461 = vrot.lane.b32.xlu0 %v3462_v20, %s3359_s12 }
  0xaf   : > { %v1096_v12 = vsel %vm1094_vm5, %v1077_v6, %v3659_v14  ;;  %2463 = vrot.lane.b32.xlu1 %v3476_v22, %s3359_s12 }
  0xb0   : > { %3115 = vmatmul.mubr.msk.bf16.vlgmr.msra.gmra.mrb[16].mxu1 %vm327_vm1, %v3556_v32  ;;  %3022 = vmatprep.subr.msk.bf16.mxu0 %vm331_vm0, %v1096_v12 }
  0xb1   : > { %1135 = vmatpush1.bf16.msra.mxu0 %v1108_v13  ;;  %594 = vmatpush1.bf16.msra.mxu1 %v567_v8  ;;  %v3812_v8 = vld [vmem:[%s4005_s2 + $0x14] sm:$0xf] }
  0xb2   : > { %v3678_v17 = vpop.permute.xlu1 %1086  ;;  %v1085_v19 = vpop.permute.xlu0 %1084  ;;  %625 = vmatprep.mubr.bf16.mxu1 %v3349_v0  ;;  %3004 = vmatprep.subr.msk.bf16.mxu1 %vm331_vm0, %v3425_v11 }
  0xb3   : > { %v1099_v21 = vsel %vm1094_vm5, %v3657_v10, %v1085_v19  ;;  %v1100_v23 = vsel %vm1094_vm5, %v1085_v19, %v3678_v17  ;;  %2465 = vrot.lane.b32.xlu0 %v3433_v15, %s3359_s12  ;;  %2467 = vrot.lane.b32.xlu1 %v3487_v24, %s3359_s12 }
  0xb4   : > { %v1120_v25 = vsel %vm331_vm0, %v1099_v21, 0  ;;  %3023 = vmatmul.mubr.msk.bf16.vlgmr.msra.gmra.mrb[8].mxu0 %vm327_vm1, %v3676_v5  ;;  %3026 = vmatprep.subr.msk.bf16.mxu0 %vm331_vm0, %v1100_v23 }
  0xb5   : > { %1217 = vmatpush1.bf16.msra.mxu0 %v1120_v25  ;;  %1248 = vmatprep.mubr.bf16.mxu0 %v3349_v0 }
  0xb6   : > { %v1093_v11 = vpop.permute.xlu1 %1092  ;;  %v3696_v26 = vpop.permute.xlu0 %1090  ;;  %3130 = vmatprep.subr.bf16.mxu0 %v3351_v18 }
  0xb7   : > { %v1103_v15 = vsel %vm1094_vm5, %v3696_v26, %v1093_v11 }
  0xb8   : > { %3003 = vmatmul.mubr.msk.bf16.vlgmr.msra.gmra.mrb[0].mxu1 %vm327_vm1, %v3440_v16  ;;  %v1132_v24 = vsel %vm331_vm0, %v1103_v15, 0 }
  0xb9   : > { %635 = vmatpush1.bf16.msra.mxu1 %v573_v27  ;;  %666 = vmatprep.mubr.bf16.mxu1 %v3349_v0 }
  0xba   : > { %v1352_v28 = vpop.permute.xlu1 %1351  ;;  %v1350_v29 = vpop.permute.xlu0 %1349  ;;  %3008 = vmatprep.subr.msk.bf16.mxu1 %vm331_vm0, %v3476_v22 }
  0xbb   : > { %v1370_v32 = vsel %vm1369_vm6, %v1350_v29, %v1352_v28 }
  0xbc   : > { %3027 = vmatmul.mubr.msk.bf16.vlgmr.msra.gmra.mrb[0].mxu0 %vm327_vm1, %v3676_v5  ;;  %v1383_v34 = vsel %vm331_vm0, %v1370_v32, 0 }
  0xbd   : > { %3131 = vmatpush3.bf16.msra.mxu0 %v1132_v24  ;;  %3132 = vmatprep.mubr.msk.bf16.mxu0 %vm3352_vm2, %v3351_v18 }
  0xbe   : > { %v806_v4 = vpop.permute.xlu1 %805  ;;  %v3713_v30 = vpop.permute.xlu0 %1353 }
  0xbf   : > { %v823_v33 = vsel %vm819_vm4, %v806_v4, %v3595_v50  ;;  %v1371_v22 = vsel %vm1369_vm6, %v1352_v28, %v3713_v30  ;;  %v822_v36 = vsel %vm819_vm4, %v3569_v38, %v806_v4  ;;  %v3750_v38 = vld [vmem:[%s4005_s2 + $0x10] sm:$0xf] }
  0xc0   : > { %3005 = vmatmul.mubr.msk.bf16.vlgmr.msra.gmra.mrb[4].mxu1 %vm327_vm1, %v3440_v16  ;;  %3032 = vmatprep.subr.msk.bf16.mxu0 %vm331_vm0, %v1371_v22  ;;  %v839_v43 = vsel %vm331_vm0, %v822_v36, 0 }
  0xc1   : > { %717 = vmatpush1.bf16.msra.mxu1 %v585_v31  ;;  %748 = vmatprep.mubr.bf16.mxu1 %v3349_v0 }
  0xc2   : > { %3014 = vmatprep.subr.msk.bf16.mxu1 %vm331_vm0, %v823_v33  ;;  %v1360_v20 = vpop.permute.xlu1 %1359  ;;  %v3728_v35 = vpop.permute.xlu0 %1357 }
  0xc3   : > { %v1374_v40 = vsel %vm1369_vm6, %v3728_v35, %v1360_v20 }
  0xc4   : > { %3133 = vmatmul.mubr.msk.bf16.vlgmr.msra.gmra.mrb[4].mxu0 %vm327_vm1, %v3676_v5  ;;  %v1395_v44 = vsel %vm331_vm0, %v1374_v40, 0 }
  0xc5   : > { %1410 = vmatpush1.bf16.msra.mxu0 %v1383_v34  ;;  %1441 = vmatprep.mubr.bf16.mxu0 %v3349_v0 }
  0xc6   : > { %v814_v37 = vpop.permute.xlu1 %813  ;;  %v3735_v39 = vpop.permute.xlu0 %1361 }
  0xc7   : > { %v827_v41 = vsel %vm819_vm4, %v814_v37, %v3619_v57  ;;  %v1375_v42 = vsel %vm1369_vm6, %v1360_v20, %v3735_v39 }
  0xc8   : > { %3009 = vmatmul.mubr.msk.bf16.vlgmr.msra.gmra.mrb[12].mxu1 %vm327_vm1, %v3440_v16  ;;  %3036 = vmatprep.subr.msk.bf16.mxu0 %vm331_vm0, %v1375_v42  ;;  %v826_v16 = vsel %vm819_vm4, %v3607_v53, %v814_v37  ;;  %v3863_v42 = vld [vmem:[%s4005_s2 + $0x18] sm:$0xf] }
  0xc9   : > { %901 = vmatpush1.bf16.msra.mxu1 %v839_v43  ;;  %932 = vmatprep.mubr.bf16.mxu1 %v3349_v0  ;;  %v851_v52 = vsel %vm331_vm0, %v826_v16, 0 }
  0xca   : > { %3018 = vmatprep.subr.msk.bf16.mxu1 %vm331_vm0, %v827_v41  ;;  %v1368_v45 = vpop.permute.xlu1 %1367  ;;  %v3755_v46 = vpop.permute.xlu0 %1365 }
  0xcb   : > { %v1378_v50 = vsel %vm1369_vm6, %v3755_v46, %v1368_v45 }
  0xcc   : > { %3033 = vmatmul.mubr.msk.bf16.vlgmr.msra.gmra.mrb[8].mxu0 %vm327_vm1, %v3750_v38  ;;  %v1407_v53 = vsel %vm331_vm0, %v1378_v50, 0 }
  0xcd   : > { %1492 = vmatpush1.bf16.msra.mxu0 %v1395_v44  ;;  %1523 = vmatprep.mubr.bf16.mxu0 %v3349_v0 }
  0xce   : > { %v1625_v48 = vpop.permute.xlu1 %1624  ;;  %v1081_v49 = vpop.permute.xlu0 %1080  ;;  %3136 = vmatprep.subr.bf16.mxu0 %v3351_v18 }
  0xcf   : > { %v1098_v51 = vsel %vm1094_vm5, %v1081_v49, %v3657_v10  ;;  %v1097_v57 = vsel %vm1094_vm5, %v3659_v14, %v1081_v49 }
  0xd0   : > { %3015 = vmatmul.mubr.msk.bf16.vlgmr.msra.gmra.mrb[4].mxu1 %vm327_vm1, %v3587_v47  ;;  %v1114_v62 = vsel %vm331_vm0, %v1097_v57, 0 }
  0xd1   : > { %983 = vmatpush1.bf16.msra.mxu1 %v851_v52  ;;  %1014 = vmatprep.mubr.bf16.mxu1 %v3349_v0 }
  0xd2   : > { %3024 = vmatprep.subr.msk.bf16.mxu1 %vm331_vm0, %v1098_v51  ;;  %v3773_v54 = vpop.permute.xlu1 %1628  ;;  %v1627_v55 = vpop.permute.xlu0 %1626 }
  0xd3   : > { %v1646_v56 = vsel %vm1644_vm7, %v1627_v55, %v3773_v54  ;;  %v1645_v60 = vsel %vm1644_vm7, %v1625_v48, %v1627_v55 }
  0xd4   : > { %3037 = vmatmul.mubr.msk.bf16.vlgmr.msra.gmra.mrb[0].mxu0 %vm327_vm1, %v3750_v38  ;;  %v1658_v63 = vsel %vm331_vm0, %v1645_v60, 0 }
  0xd5   : > { %3137 = vmatpush3.bf16.msra.mxu0 %v1407_v53  ;;  %3138 = vmatprep.mubr.msk.bf16.mxu0 %vm3352_vm2, %v3351_v18 }
  0xd6   : > { %v1633_v58 = vpop.permute.xlu1 %1632  ;;  %v1089_v59 = vpop.permute.xlu0 %1088  ;;  %3042 = vmatprep.subr.msk.bf16.mxu0 %vm331_vm0, %v1646_v56 }
  0xd7   : > { %v1102_v61 = vsel %vm1094_vm5, %v1089_v59, %v3696_v26  ;;  %v1101_v6 = vsel %vm1094_vm5, %v3678_v17, %v1089_v59 }
  0xd8   : > { %3019 = vmatmul.mubr.msk.bf16.vlgmr.msra.gmra.mrb[12].mxu1 %vm327_vm1, %v3587_v47  ;;  %v1126_v14 = vsel %vm331_vm0, %v1101_v6, 0 }
  0xd9   : > { %1176 = vmatpush1.bf16.msra.mxu1 %v1114_v62  ;;  %1207 = vmatprep.mubr.bf16.mxu1 %v3349_v0 }
  0xda   : > { %3028 = vmatprep.subr.msk.bf16.mxu1 %vm331_vm0, %v1102_v61  ;;  %v3793_v1 = vpop.permute.xlu1 %1636  ;;  %v1635_v2 = vpop.permute.xlu0 %1634 }
  0xdb   : > { %v1650_v3 = vsel %vm1644_vm7, %v1635_v2, %v3793_v1  ;;  %v1649_v9 = vsel %vm1644_vm7, %v1633_v58, %v1635_v2 }
  0xdc   : > { %3139 = vmatmul.mubr.msk.bf16.vlgmr.msra.gmra.mrb[4].mxu0 %vm327_vm1, %v3750_v38  ;;  %v1670_v12 = vsel %vm331_vm0, %v1649_v9, 0  ;;  %v3061_v9 = vld [vmem:[%s4005_s2 + $0x1c] sm:$0xf] }
  0xdd   : > { %1685 = vmatpush1.bf16.msra.mxu0 %v1658_v63  ;;  %1716 = vmatprep.mubr.bf16.mxu0 %v3349_v0 }
  0xde   : > { %v1641_v47 = vpop.permute.xlu1 %1640  ;;  %v1356_v7 = vpop.permute.xlu0 %1355  ;;  %3046 = vmatprep.subr.msk.bf16.mxu0 %vm331_vm0, %v1650_v3 }
  0xdf   : > { %v1373_v10 = vsel %vm1369_vm6, %v1356_v7, %v3728_v35  ;;  %v1372_v19 = vsel %vm1369_vm6, %v3713_v30, %v1356_v7 }
  0xe0   : > { %3025 = vmatmul.mubr.msk.bf16.vlgmr.msra.gmra.mrb[4].mxu1 %vm327_vm1, %v3676_v5  ;;  %v1389_v11 = vsel %vm331_vm0, %v1372_v19, 0 }
  0xe1   : > { %1258 = vmatpush1.bf16.msra.mxu1 %v1126_v14  ;;  %1289 = vmatprep.mubr.bf16.mxu1 %v3349_v0 }
  0xe2   : > { %3034 = vmatprep.subr.msk.bf16.mxu1 %vm331_vm0, %v1373_v10  ;;  %v1364_v13 = vpop.permute.xlu1 %1363  ;;  %v1643_v17 = vpop.permute.xlu0 %1642 }
  0xe3   : > { %v1653_v25 = vsel %vm1644_vm7, %v1641_v47, %v1643_v17  ;;  %v1377_v26 = vsel %vm1369_vm6, %v1364_v13, %v3755_v46 }
  0xe4   : > { %3043 = vmatmul.mubr.msk.bf16.vlgmr.msra.gmra.mrb[8].mxu0 %vm327_vm1, %v3812_v8  ;;  %v1682_v27 = vsel %vm331_vm0, %v1653_v25, 0 }
  0xe5   : > { %1767 = vmatpush1.bf16.msra.mxu0 %v1670_v12  ;;  %1798 = vmatprep.mubr.bf16.mxu0 %v3349_v0 }
  0xe6   : > { %v1902_v21 = vpop.permute.xlu1 %1901  ;;  %v1900_v23 = vpop.permute.xlu0 %1899  ;;  %3142 = vmatprep.subr.bf16.mxu0 %v3351_v18 }
  0xe7   : > { %v1920_v30 = vsel %vm1919_vm8, %v1900_v23, %v1902_v21 }
  0xe8   : > { %3029 = vmatmul.mubr.msk.bf16.vlgmr.msra.gmra.mrb[12].mxu1 %vm327_vm1, %v3676_v5  ;;  %v1376_v5 = vsel %vm1369_vm6, %v3735_v39, %v1364_v13  ;;  %v1933_v33 = vsel %vm331_vm0, %v1920_v30, 0 }
  0xe9   : > { %1451 = vmatpush1.bf16.msra.mxu1 %v1389_v11  ;;  %1482 = vmatprep.mubr.bf16.mxu1 %v3349_v0  ;;  %v1401_v31 = vsel %vm331_vm0, %v1376_v5, 0 }
  0xea   : > { %3038 = vmatprep.subr.msk.bf16.mxu1 %vm331_vm0, %v1377_v26  ;;  %v1631_v15 = vpop.permute.xlu1 %1630  ;;  %v1904_v24 = vpop.permute.xlu0 %1903 }
  0xeb   : > { %v1921_v28 = vsel %vm1919_vm8, %v1902_v21, %v1904_v24  ;;  %v1648_v32 = vsel %vm1644_vm7, %v1631_v15, %v1633_v58  ;;  %v1647_v35 = vsel %vm1644_vm7, %v3773_v54, %v1631_v15 }
  0xec   : > { %3047 = vmatmul.mubr.msk.bf16.vlgmr.msra.gmra.mrb[0].mxu0 %vm327_vm1, %v3812_v8  ;;  %v1664_v40 = vsel %vm331_vm0, %v1647_v35, 0 }
  0xed   : > { %3143 = vmatpush3.bf16.msra.mxu0 %v1682_v27  ;;  %3144 = vmatprep.mubr.msk.bf16.mxu0 %vm3352_vm2, %v3351_v18 }
  0xee   : > { %v1910_v29 = vpop.permute.xlu1 %1909  ;;  %v1908_v4 = vpop.permute.xlu0 %1907  ;;  %3052 = vmatprep.subr.msk.bf16.mxu0 %vm331_vm0, %v1921_v28 }
  0xef   : > { %v1924_v39 = vsel %vm1919_vm8, %v1908_v4, %v1910_v29 }
  0xf0   : > { %3035 = vmatmul.mubr.msk.bf16.vlgmr.msra.gmra.mrb[4].mxu1 %vm327_vm1, %v3750_v38  ;;  %v1945_v43 = vsel %vm331_vm0, %v1924_v39, 0 }
  0xf1   : > { %1533 = vmatpush1.bf16.msra.mxu1 %v1401_v31  ;;  %1564 = vmatprep.mubr.bf16.mxu1 %v3349_v0 }
  0xf2   : > { %3044 = vmatprep.subr.msk.bf16.mxu1 %vm331_vm0, %v1648_v32  ;;  %v1639_v22 = vpop.permute.xlu1 %1638  ;;  %v1912_v34 = vpop.permute.xlu0 %1911 }
  0xf3   : > { %v1925_v20 = vsel %vm1919_vm8, %v1910_v29, %v1912_v34  ;;  %v1652_v41 = vsel %vm1644_vm7, %v1639_v22, %v1641_v47 }
  0xf4   : > { %3145 = vmatmul.mubr.msk.bf16.vlgmr.msra.gmra.mrb[4].mxu0 %vm327_vm1, %v3812_v8 }
  0xf5   : > { %1960 = vmatpush1.bf16.msra.mxu0 %v1933_v33  ;;  %1991 = vmatprep.mubr.bf16.mxu0 %v3349_v0 }
  0xf6   : > { %v1916_v36 = vpop.permute.xlu0 %1915  ;;  %3056 = vmatprep.subr.msk.bf16.mxu0 %vm331_vm0, %v1925_v20  ;;  %v1918_v37 = vpop.permute.xlu1 %1917 }
  0xf7   : > { %v1928_v16 = vsel %vm1919_vm8, %v1916_v36, %v1918_v37 }
  0xf8   : > { %3039 = vmatmul.mubr.msk.bf16.vlgmr.msra.gmra.mrb[12].mxu1 %vm327_vm1, %v3750_v38  ;;  %v1651_v38 = vsel %vm1644_vm7, %v3793_v1, %v1639_v22  ;;  %v1957_v51 = vsel %vm331_vm0, %v1928_v16, 0 }
  0xf9   : > { %1726 = vmatpush1.bf16.msra.mxu1 %v1664_v40  ;;  %1757 = vmatprep.mubr.bf16.mxu1 %v3349_v0  ;;  %v1676_v49 = vsel %vm331_vm0, %v1651_v38, 0 }
  0xfa   : > { %3048 = vmatprep.subr.msk.bf16.mxu1 %vm331_vm0, %v1652_v41  ;;  %v1906_v44 = vpop.permute.xlu0 %1905  ;;  %v2175_v45 = vpop.permute.xlu1 %2174 }
  0xfb   : > { %v1923_v50 = vsel %vm1919_vm8, %v1906_v44, %v1908_v4  ;;  %v1922_v55 = vsel %vm1919_vm8, %v1904_v24, %v1906_v44 }
  0xfc   : > { %3053 = vmatmul.mubr.msk.bf16.vlgmr.msra.gmra.mrb[8].mxu0 %vm327_vm1, %v3863_v42  ;;  %v1939_v59 = vsel %vm331_vm0, %v1922_v55, 0 }
  0xfd   : > { %2042 = vmatpush1.bf16.msra.mxu0 %v1945_v43  ;;  %2073 = vmatprep.mubr.bf16.mxu0 %v3349_v0 }
  0xfe   : > { %v2177_v46 = vpop.permute.xlu0 %2176  ;;  %3148 = vmatprep.subr.bf16.mxu0 %v3351_v18 }
  0xff   : > { %v2179_v48 = vpop.permute.xlu1 %2178  ;;  %v2195_v57 = vsel %vm2194_vm9, %v2175_v45, %v2177_v46 }
 0x100   : > { %3045 = vmatmul.mubr.msk.bf16.vlgmr.msra.gmra.mrb[4].mxu1 %vm327_vm1, %v3812_v8  ;;  %v2196_v53 = vsel %vm2194_vm9, %v2177_v46, %v2179_v48  ;;  %v2208_v61 = vsel %vm331_vm0, %v2195_v57, 0 }
 0x101   : > { %1808 = vmatpush1.bf16.msra.mxu1 %v1676_v49  ;;  %1839 = vmatprep.mubr.bf16.mxu1 %v3349_v0 }
 0x102   : > { %3054 = vmatprep.subr.msk.bf16.mxu1 %vm331_vm0, %v1923_v50  ;;  %v1914_v52 = vpop.permute.xlu0 %1913 }
 0x103   : > { %v1927_v58 = vsel %vm1919_vm8, %v1914_v52, %v1916_v36  ;;  %v1926_v1 = vsel %vm1919_vm8, %v1912_v34, %v1914_v52  ;;  %v3071_v36 = vld [vmem:[%s4005_s2 + $0x20] sm:$0xf] }
 0x104   : > { %3057 = vmatmul.mubr.msk.bf16.vlgmr.msra.gmra.mrb[0].mxu0 %vm327_vm1, %v3863_v42  ;;  %v2183_v54 = vpop.permute.xlu1 %2182  ;;  %v1951_v7 = vsel %vm331_vm0, %v1926_v1, 0 }
 0x105   : > { %3149 = vmatpush3.bf16.msra.mxu0 %v1957_v51  ;;  %3150 = vmatprep.mubr.msk.bf16.mxu0 %vm3352_vm2, %v3351_v18 }
 0x106   : > { %v2185_v56 = vpop.permute.xlu0 %2184  ;;  %3062 = vmatprep.subr.msk.bf16.mxu0 %vm331_vm0, %v2196_v53  ;;  %v2726_v53 = vlaneseq }
 0x107   : > { %v2199_v3 = vsel %vm2194_vm9, %v2183_v54, %v2185_v56 }
 0x108   : > { %3049 = vmatmul.mubr.msk.bf16.vlgmr.msra.gmra.mrb[12].mxu1 %vm327_vm1, %v3812_v8  ;;  %v2187_v60 = vpop.permute.xlu1 %2186  ;;  %v2220_v14 = vsel %vm331_vm0, %v2199_v3, 0 }
 0x109   : > { %2001 = vmatpush1.bf16.msra.mxu1 %v1939_v59  ;;  %2032 = vmatprep.mubr.bf16.mxu1 %v3349_v0  ;;  %v2200_v62 = vsel %vm2194_vm9, %v2185_v56, %v2187_v60  ;;  %v2722_v56 = vld [vmem:[%s3976_s30] sm:$0xff] }
 0x10a   : > { %3058 = vmatprep.subr.msk.bf16.mxu1 %vm331_vm0, %v1927_v58 }
 0x10b   : > { %v2181_v63 = vpop.permute.xlu0 %2180 }
 0x10c   : > { %3151 = vmatmul.mubr.msk.bf16.vlgmr.msra.gmra.mrb[4].mxu0 %vm327_vm1, %v3863_v42  ;;  %v2198_v6 = vsel %vm2194_vm9, %v2181_v63, %v2183_v54  ;;  %v2197_v12 = vsel %vm2194_vm9, %v2179_v48, %v2181_v63  ;;  %v2727_v54 = vshrl.u32 %v2726_v53, 7 }
 0x10d   : > { %2235 = vmatpush1.bf16.msra.mxu0 %v2208_v61  ;;  %v2191_v2 = vpop.permute.xlu1 %2190  ;;  %2266 = vmatprep.mubr.bf16.mxu0 %v3349_v0  ;;  %v2214_v21 = vsel %vm331_vm0, %v2197_v12, 0 }
 0x10e   : > { %3066 = vmatprep.subr.msk.bf16.mxu0 %vm331_vm0, %v2200_v62  ;;  %v2728_v55 = vsub.s32 0, %v2727_v54  ;;  %v2732_v57 = vsub.s32 1, %v2727_v54  ;;  %v2736_v58 = vsub.s32 2, %v2727_v54  ;;  %v2740_v59 = vsub.s32 3, %v2727_v54 }
 0x10f   : > { %v2193_v47 = vpop.permute.xlu0 %2192  ;;  %v2748_v12 = vsub.s32 5, %v2727_v54 }
 0x110   : > { %3055 = vmatmul.mubr.msk.bf16.vlgmr.msra.gmra.mrb[4].mxu1 %vm327_vm1, %v3863_v42  ;;  %v2203_v19 = vsel %vm2194_vm9, %v2191_v2, %v2193_v47  ;;  %v2733_v62 = vrot.slane %v2722_v56, %v2732_v57  ;;  %v2741_v47 = vrot.slane %v2722_v56, %v2740_v59  ;;  %v3081_v57 = vld [vmem:[%s3976_s30 + $0x8] ss:$0 sm:$0xff] }
 0x111   : > { %2083 = vmatpush1.bf16.msra.mxu1 %v1951_v7  ;;  %v2189_v10 = vpop.permute.xlu1 %2188  ;;  %2114 = vmatprep.mubr.bf16.mxu1 %v3349_v0  ;;  %v2232_v11 = vsel %vm331_vm0, %v2203_v19, 0 }
 0x112   : > { %3064 = vmatprep.subr.msk.bf16.mxu1 %vm331_vm0, %v2198_v6  ;;  %v2202_v17 = vsel %vm2194_vm9, %v2189_v10, %v2191_v2  ;;  %v2201_v15 = vsel %vm2194_vm9, %v2187_v60, %v2189_v10  ;;  %v2729_v60 = vrot.slane %v2722_v56, %v2728_v55  ;;  %v2737_v2 = vrot.slane %v2722_v56, %v2736_v58 }
 0x113   : > { %v2226_v29 = vsel %vm331_vm0, %v2201_v15, 0  ;;  %v2744_v10 = vsub.s32 4, %v2727_v54 }
 0x114   : > { %3063 = vmatmul.mubr.msk.bf16.vlgmr.msra.gmra.mrb[8].mxu0 %vm327_vm1, %v3061_v9  ;;  %v2450_v8 = vpop.permute.xlu0 %2449 }
 0x115   : > { %2317 = vmatpush1.bf16.msra.mxu0 %v2220_v14  ;;  %2348 = vmatprep.mubr.bf16.mxu0 %v3349_v0  ;;  %v2452_v13 = vpop.permute.xlu1 %2451 }
 0x116   : > { %3154 = vmatprep.subr.bf16.mxu0 %v3351_v18  ;;  %v2470_v28 = vsel %vm2469_vm10, %v2450_v8, %v2452_v13 }
 0x117   : > { %v2483_v30 = vsel %vm331_vm0, %v2470_v28, 0 }
 0x118   : > { %3059 = vmatmul.mubr.msk.bf16.vlgmr.msra.gmra.mrb[12].mxu1 %vm327_vm1, %v3863_v42  ;;  %v2454_v23 = vpop.permute.xlu0 %2453 }
 0x119   : > { %2276 = vmatpush1.bf16.msra.mxu1 %v2214_v21  ;;  %2307 = vmatprep.mubr.bf16.mxu1 %v3349_v0  ;;  %v2456_v25 = vpop.permute.xlu1 %2455  ;;  %v2471_v26 = vsel %vm2469_vm10, %v2452_v13, %v2454_v23  ;;  %v2752_v21 = vsub.s32 6, %v2727_v54 }
 0x11a   : > { %3068 = vmatprep.subr.msk.bf16.mxu1 %vm331_vm0, %v2202_v17  ;;  %v2472_v31 = vsel %vm2469_vm10, %v2454_v23, %v2456_v25  ;;  %v2756_v23 = vsub.s32 7, %v2727_v54 }
 0x11b   : > { %v2489_v34 = vsel %vm331_vm0, %v2472_v31, 0 }
 0x11c   : > { %3067 = vmatmul.mubr.msk.bf16.vlgmr.msra.gmra.mrb[0].mxu0 %vm327_vm1, %v3061_v9  ;;  %v2458_v27 = vpop.permute.xlu0 %2457 }
 0x11d   : > { %3155 = vmatpush3.bf16.msra.mxu0 %v2232_v11  ;;  %3156 = vmatprep.mubr.msk.bf16.mxu0 %vm3352_vm2, %v3351_v18  ;;  %v2460_v24 = vpop.permute.xlu1 %2459  ;;  %v2473_v5 = vsel %vm2469_vm10, %v2456_v25, %v2458_v27 }
 0x11e   : > { %3072 = vmatprep.subr.msk.bf16.mxu0 %vm331_vm0, %v2471_v26  ;;  %v2474_v20 = vsel %vm2469_vm10, %v2458_v27, %v2460_v24 }
 0x11f   : > { %v2495_v37 = vsel %vm331_vm0, %v2474_v20, 0  ;;  %v2757_v20 = vrot.slane %v2722_v56, %v2756_v23 }
 0x120   : > { %3065 = vmatmul.mubr.msk.bf16.vlgmr.msra.gmra.mrb[4].mxu1 %vm327_vm1, %v3061_v9  ;;  %v2462_v4 = vpop.permute.xlu0 %2461 }
 0x121   : > { %2358 = vmatpush1.bf16.msra.mxu1 %v2226_v29  ;;  %2389 = vmatprep.mubr.bf16.mxu1 %v3349_v0  ;;  %v2475_v32 = vsel %vm2469_vm10, %v2460_v24, %v2462_v4  ;;  %v2464_v33 = vpop.permute.xlu1 %2463 }
 0x122   : > { %3074 = vmatprep.subr.msk.bf16.mxu1 %vm331_vm0, %v2473_v5  ;;  %v2476_v39 = vsel %vm2469_vm10, %v2462_v4, %v2464_v33  ;;  %v2745_v5 = vrot.slane %v2722_v56, %v2744_v10 }
 0x123   : > { %v2501_v41 = vsel %vm331_vm0, %v2476_v39, 0 }
 0x124   : > { %3157 = vmatmul.mubr.msk.bf16.vlgmr.msra.gmra.mrb[4].mxu0 %vm327_vm1, %v3061_v9 }
 0x125   : > { %2510 = vmatpush1.bf16.msra.mxu0 %v2483_v30  ;;  %2541 = vmatprep.mubr.bf16.mxu0 %v3349_v0  ;;  %v2466_v22 = vpop.permute.xlu0 %2465  ;;  %v2468_v40 = vpop.permute.xlu1 %2467 }
 0x126   : > { %3076 = vmatprep.subr.msk.bf16.mxu0 %vm331_vm0, %v2475_v32  ;;  %v2477_v35 = vsel %vm2469_vm10, %v2464_v33, %v2466_v22  ;;  %v2478_v42 = vsel %vm2469_vm10, %v2466_v22, %v2468_v40  ;;  %v2749_v32 = vrot.slane %v2722_v56, %v2748_v12 }
 0x127   : > { %v2507_v43 = vsel %vm331_vm0, %v2478_v42, 0 }
 0x128   : > { %3069 = vmatmul.mubr.msk.bf16.vlgmr.msra.gmra.mrb[12].mxu1 %vm327_vm1, %v3061_v9 }
 0x129   : > { %2551 = vmatpush1.bf16.msra.mxu1 %v2489_v34  ;;  %2582 = vmatprep.mubr.bf16.mxu1 %v3349_v0  ;;  %v2753_v34 = vrot.slane %v2722_v56, %v2752_v21 }
 0x12a   : > { %3078 = vmatprep.subr.msk.bf16.mxu1 %vm331_vm0, %v2477_v35 }
 0x12c   : > { %3073 = vmatmul.mubr.msk.bf16.vlgmr.msra.gmra.mrb[8].mxu0 %vm327_vm1, %v3071_v36 }
 0x12d   : > { %2592 = vmatpush1.bf16.msra.mxu0 %v2495_v37  ;;  %2623 = vmatprep.mubr.bf16.mxu0 %v3349_v0 }
 0x12e   : > { %3160 = vmatprep.subr.bf16.mxu0 %v3351_v18 }
 0x130   : > { %3075 = vmatmul.mubr.msk.bf16.vlgmr.msra.gmra.mrb[4].mxu1 %vm327_vm1, %v3071_v36 }
 0x131   : > { %2633 = vmatpush1.bf16.msra.mxu1 %v2501_v41  ;;  %2664 = vmatprep.mubr.bf16.mxu1 %v3349_v0 }
 0x134   : > { %3077 = vmatmul.mubr.msk.bf16.vlgmr.msra.gmra.mrb[0].mxu0 %vm327_vm1, %v3071_v36 }
 0x135   : > { %3161 = vmatpush3.bf16.msra.mxu0 %v2507_v43  ;;  %3162 = vmatprep.mubr.msk.bf16.mxu0 %vm3352_vm2, %v3351_v18 }
 0x138   : > { %3079 = vmatmul.mubr.msk.bf16.vlgmr.msra.gmra.mrb[12].mxu1 %vm327_vm1, %v3071_v36 }
 0x13c   : > { %3163 = vmatmul.mubr.msk.bf16.vlgmr.msra.gmra.mrb[4].mxu0 %vm327_vm1, %v3071_v36 }
 0x173   : > { %v475_v44 = vpop.f32.mrb[8].mxu1 }
 0x174   : > { %v3968_v45 = vpop.f32.mrb[9].mxu1 }
 0x175   : > { %v479_v38 = vpop.f32.mrb[10].mxu1 }
 0x176   : > { %v480_v46 = vpop.f32.mrb[11].mxu1 }
 0x183   : > { %v3970_v16 = vpop.f32.mrb[16].mxu1 }
 0x184   : > { %v3116_v0 = vpop.f32.mrb[17].mxu1 }
 0x185   : > { %v560_v48 = vpop.f32.mrb[18].mxu1 }
 0x186   : > { %v3117_v49 = vpop.f32.mrb[19].mxu1 }
 0x18b   : > { %v627_v50 = vpop.f32.mrb[0].mxu1 }
 0x18c   : > { %v629_v51 = vpop.f32.mrb[1].mxu1 }
 0x18d   : > { %v631_v52 = vpop.f32.mrb[2].mxu1 }
 0x18e   : > { %v632_v18 = vpop.f32.mrb[3].mxu1 }
 0x1ff   : > { %v2543_v61 = vpop.f32.mrb[8].mxu0 }
 0x200   : > { %v3166_v63 = vadd.f32 %v2543_v61, %v627_v50  ;;  %v2545_v1 = vpop.f32.mrb[9].mxu0 }
 0x201   : > { %v3167_v3 = vadd.f32 %v2545_v1, %v629_v51  ;;  %v2547_v6 = vpop.f32.mrb[10].mxu0 }
 0x202   : > { %v2771_v7 = vmul.f32 %v3166_v63, %v2729_v60  ;;  %v2548_v9 = vpop.f32.mrb[11].mxu0 }
 0x203   : > { %v2772_v14 = vmul.f32 %v3167_v3, %v2733_v62  ;;  %v2584_v8 = vpop.f32.mrb[4].mxu1 }
 0x204   : > { %v2834_v13 = vmul.f32 %v2771_v7, %v2771_v7  ;;  %v2773_v17 = vmul.f32 %v2737_v2, %v2584_v8  ;;  %v2586_v19 = vpop.f32.mrb[5].mxu1 }
 0x205   : > { %v3089_v25 = vpack.c.bf16 %v2772_v14, %v2771_v7  ;;  %v2835_v11 = vmul.f32 %v2772_v14, %v2772_v14  ;;  %v2822_v26 = vadd.f32 %v2772_v14, %v2771_v7  ;;  %v2774_v27 = vmul.f32 %v2741_v47, %v2586_v19  ;;  %v2588_v15 = vpop.f32.mrb[6].mxu1 }
 0x206   : > { %v2836_v24 = vmul.f32 %v2773_v17, %v2773_v17  ;;  %v2589_v28 = vpop.f32.mrb[7].mxu1 }
 0x207   : > { %2817 = vst [vmem:[%s3983_s9] sm:$0xff] %v3089_v25  ;;  %v2823_v29 = vadd.f32 %v2822_v26, %v2773_v17  ;;  %v2843_v4 = vadd.f32 %v2835_v11, %v2834_v13  ;;  %v3090_v30 = vpack.c.bf16 %v2774_v27, %v2773_v17  ;;  %v2625_v31 = vpop.f32.mrb[0].mxu0  ;;  %v2837_v37 = vmul.f32 %v2774_v27, %v2774_v27 }
 0x208   : > { %v3168_v33 = vadd.f32 %v2625_v31, %v475_v44  ;;  %v2627_v22 = vpop.f32.mrb[1].mxu0 }
 0x209   : > { %v2844_v35 = vadd.f32 %v2843_v4, %v2836_v24  ;;  %2818 = vst [vmem:[%s3983_s9 + $0x8] sm:$0xff] %v3090_v30  ;;  %v2824_v36 = vadd.f32 %v2823_v29, %v2774_v27  ;;  %v3169_v39 = vadd.f32 %v2627_v22, %v3968_v45  ;;  %v2629_v40 = vpop.f32.mrb[2].mxu0 }
 0x20a   : > { %v2775_v41 = vmul.f32 %v3168_v33, %v2745_v5  ;;  %v2630_v42 = vpop.f32.mrb[3].mxu0 }
 0x20b   : > { %v2845_v43 = vadd.f32 %v2844_v35, %v2837_v37  ;;  %v2776_v38 = vmul.f32 %v3169_v39, %v2749_v32  ;;  %v2666_v46 = vpop.f32.mrb[12].mxu1 }
 0x20c   : > { %v2825_v0 = vadd.f32 %v2824_v36, %v2775_v41  ;;  %v2838_v48 = vmul.f32 %v2775_v41, %v2775_v41  ;;  %v2777_v44 = vmul.f32 %v2753_v34, %v2666_v46  ;;  %v2668_v49 = vpop.f32.mrb[13].mxu1 }
 0x20d   : > { %v3091_v50 = vpack.c.bf16 %v2776_v38, %v2775_v41  ;;  %v2839_v51 = vmul.f32 %v2776_v38, %v2776_v38  ;;  %v2778_v52 = vmul.f32 %v2757_v20, %v2668_v49  ;;  %v2670_v18 = vpop.f32.mrb[14].mxu1 }
 0x20e   : > { %v2846_v53 = vadd.f32 %v2845_v43, %v2838_v48  ;;  %v2826_v54 = vadd.f32 %v2825_v0, %v2776_v38  ;;  %v2671_v45 = vpop.f32.mrb[15].mxu1  ;;  %v2840_v59 = vmul.f32 %v2777_v44, %v2777_v44 }
 0x20f   : > { %2819 = vst [vmem:[%s3983_s9 + $0x10] sm:$0xff] %v3091_v50  ;;  %v3092_v55 = vpack.c.bf16 %v2778_v52, %v2777_v44  ;;  %v2707_v56 = vpop.f32.mrb[4].mxu0  ;;  %v2841_v1 = vmul.f32 %v2778_v52, %v2778_v52 }
 0x210   : > { %v2827_v58 = vadd.f32 %v2826_v54, %v2777_v44  ;;  %v3170_v60 = vadd.f32 %v2707_v56, %v3970_v16  ;;  %v3164_v61 = vpop.f32.mrb[5].mxu0  ;;  %v2847_v62 = vadd.f32 %v2846_v53, %v2839_v51 }
 0x211   : > { %2820 = vst [vmem:[%s3983_s9 + $0x18] sm:$0xff] %v3092_v55  ;;  %v2710_v63 = vpop.f32.mrb[6].mxu0 }
 0x212   : > { %v2779_v2 = vmul.f32 %v3170_v60, %v3081_v57  ;;  %v3165_v3 = vpop.f32.mrb[7].mxu0  ;;  %v2828_v6 = vadd.f32 %v2827_v58, %v2778_v52  ;;  %v2848_v47 = vadd.f32 %v2847_v62, %v2840_v59 }
 0x214   : > { %v3093_v7 = vpack.c.bf16 %v2779_v2, %v2779_v2  ;;  %v2829_v9 = vadd.f32 %v2828_v6, %v2779_v2  ;;  %v2842_v10 = vmul.f32 %v2779_v2, %v2779_v2  ;;  %v2849_v14 = vadd.f32 %v2848_v47, %v2841_v1 }
 0x216   : > { %2821 = vst [vmem:[%s3983_s9 + $0x20] sm:$0xf] %v3093_v7  ;;  %2830 = vadd.xlane.f32.xlu0 %v2829_v9  ;;  %v2850_v8 = vadd.f32 %v2849_v14, %v2842_v10 }
 0x218   : > { %2851 = vadd.xlane.f32.xlu1 %v2850_v8 }
 0x2a3   : > { %v2831_v16 = vpop.xlane.xlu0 %2830 }
 0x2a4   : > { %2833 = vst.msk [vmem:[%s258_s13] sm:$0xff] %vm2832_vm11, %v2831_v16 }
 0x2a5   : > { %v2852_v12 = vpop.xlane.xlu1 %2851 }
 0x2a6   : > { %2853 = vst.msk [vmem:[%s262_s16] sm:$0xff] %vm2832_vm11, %v2852_v12 }
 0x2a7 PF: > { %s16_s18 = sadd.s32 1, %s3347_s18  }
 0x2a8   : > { %p13_p4 = scmp.ge.s32.totalorder %s16_s18, 4  }
 0x2aa   :  { %15 = sbr.rel (!%p13_p4) target bundleno = 1 (0x1), region = 97 }

</bundles_post_ra>
